<compile_context>
chip_gen: v7x
topology: tpu7x:2x2x1
jax: 0.10.0
libtpu: 0.0.40
codegen_flags: <defaults>
</compile_context>

<pallas_src>
import jax
import jax.numpy as jnp
from jax.experimental import pallas as pl
from jax.experimental.pallas import tpu as pltpu

# Logical (PyTorch) dims and lane-padded dims.
D_IN, H1, H2, H3, D_OUT = 784, 300, 500, 1000, 10
H1_P, H2_P, H3_P, D_OUT_P = 384, 512, 1024, 128


def _round_up(n, m):
    return ((n + m - 1) // m) * m


def _mlp_kernel(x_ref, w1_ref, b1_ref, w2_ref, b2_ref, w3_ref, b3_ref,
                w4_ref, b4_ref, o_ref):
    # Layer 1: 784 -> 384. x is f32 in VMEM; cast to bf16 on the VPU (free filler
    # under the MXU), accumulate in f32, bias+ReLU epilogue in f32.
    h = jnp.dot(x_ref[...].astype(jnp.bfloat16), w1_ref[...],
                preferred_element_type=jnp.float32)
    h = jnp.maximum(h + b1_ref[...], 0.0).astype(jnp.bfloat16)
    # Layer 2: 384 -> 512
    h = jnp.dot(h, w2_ref[...], preferred_element_type=jnp.float32)
    h = jnp.maximum(h + b2_ref[...], 0.0).astype(jnp.bfloat16)
    # Layer 3: 512 -> 1024
    h = jnp.dot(h, w3_ref[...], preferred_element_type=jnp.float32)
    h = jnp.maximum(h + b3_ref[...], 0.0).astype(jnp.bfloat16)
    # Layer 4: 1024 -> 128 (padded logits, no activation)
    h = jnp.dot(h, w4_ref[...], preferred_element_type=jnp.float32)
    o_ref[...] = (h + b4_ref[...]).astype(o_ref.dtype)


def _choose_tile(B, tb):
    """Pick the batch tile: multiple of 8, >=256 when possible (fills the 256-wide
    MXU on v6e/v7x), <= tb, and (for B > tb) balanced so the grid has >=2 steps
    (lets v7x shard the batch axis across its 2 TensorCores)."""
    b8 = _round_up(B, 8)
    if b8 <= tb:
        # Small/medium batch: one tile covering the whole (8-aligned) batch.
        return b8
    steps = pl.cdiv(b8, tb)          # >= 2 here
    tile = _round_up(pl.cdiv(b8, steps), 8)
    return min(tb, max(256, tile))


def classifier2_forward(x, padded_params, *, tb=512):
    """x: (B, 784) float32. padded_params: bf16 weights / f32 biases (lane-padded).

    Returns (B, 10) float32 logits.
    """
    B = x.shape[0]
    tb = _round_up(max(int(tb), 8), 8)
    tile = _choose_tile(B, tb)
    Bp = _round_up(B, tile)
    grid = Bp // tile

    # Only pad the batch dim, and only when needed (zero rows -> garbage-free).
    if Bp != B:
        x_in = jnp.zeros((Bp, D_IN), jnp.float32).at[:B].set(x.astype(jnp.float32))
    else:
        x_in = x.astype(jnp.float32)

    pp = padded_params
    w1, b1 = pp["w1"], pp["b1"]
    w2, b2 = pp["w2"], pp["b2"]
    w3, b3 = pp["w3"], pp["b3"]
    w4, b4 = pp["w4"], pp["b4"]

    const_map = lambda i: (0, 0)       # weights/biases resident across grid steps
    resident = pl.Buffered(1)          # constant block -> no double buffering

    out_pad = pl.pallas_call(
        _mlp_kernel,
        out_shape=jax.ShapeDtypeStruct((Bp, D_OUT_P), jnp.float32),
        grid=(grid,),
        in_specs=[
            # x tile streams (last dim 784 == full array dim, so (8,128) rule holds)
            pl.BlockSpec((tile, D_IN), lambda i: (i, 0)),
            pl.BlockSpec((D_IN, H1_P), const_map, pipeline_mode=resident),
            pl.BlockSpec((1, H1_P), const_map, pipeline_mode=resident),
            pl.BlockSpec((H1_P, H2_P), const_map, pipeline_mode=resident),
            pl.BlockSpec((1, H2_P), const_map, pipeline_mode=resident),
            pl.BlockSpec((H2_P, H3_P), const_map, pipeline_mode=resident),
            pl.BlockSpec((1, H3_P), const_map, pipeline_mode=resident),
            pl.BlockSpec((H3_P, D_OUT_P), const_map, pipeline_mode=resident),
            pl.BlockSpec((1, D_OUT_P), const_map, pipeline_mode=resident),
        ],
        out_specs=pl.BlockSpec((tile, D_OUT_P), lambda i: (i, 0)),
        compiler_params=pltpu.CompilerParams(
            dimension_semantics=("parallel",),   # 2-TC batch sharding on v7x
            vmem_limit_bytes=32 << 20,           # covers tb=512 footprint w/ headroom
        ),
    )(x_in, w1, b1, w2, b2, w3, b3, w4, b4)

    return out_pad[:B, :D_OUT]


def init_params(key):
    """Deterministic init mimicking nn.Linear default (uniform +-1/sqrt(fan_in)).

    Weights stored (in_features, out_features); biases (1, out_features). f32.
    """
    dims = [(D_IN, H1), (H1, H2), (H2, H3), (H3, D_OUT)]
    params = {}
    keys = jax.random.split(key, 2 * len(dims))
    for i, (fan_in, fan_out) in enumerate(dims):
        bound = 1.0 / jnp.sqrt(jnp.float32(fan_in))
        w = jax.random.uniform(keys[2 * i], (fan_in, fan_out), jnp.float32,
                               minval=-bound, maxval=bound)
        b = jax.random.uniform(keys[2 * i + 1], (1, fan_out), jnp.float32,
                               minval=-bound, maxval=bound)
        params[f"w{i + 1}"] = w
        params[f"b{i + 1}"] = b
    return params


def pad_and_cast_params(params):
    """Zero-pad output dims to lane multiples; weights -> bf16, biases stay f32.

    w1 keeps its true 784 input rows (784 % 16 == 0, so bf16 tiling is legal)."""
    padded_dims = [(D_IN, H1_P), (H1_P, H2_P), (H2_P, H3_P), (H3_P, D_OUT_P)]
    out = {}
    for i, (in_p, out_p) in enumerate(padded_dims, start=1):
        w = params[f"w{i}"]
        b = params[f"b{i}"]
        wp = jnp.zeros((in_p, out_p), jnp.float32).at[:w.shape[0], :w.shape[1]].set(w)
        bp = jnp.zeros((1, out_p), jnp.float32).at[:, :b.shape[1]].set(b)
        out[f"w{i}"] = wp.astype(jnp.bfloat16)
        out[f"b{i}"] = bp
    return out


def reference_forward_f32(x, params):
    """Original module semantics, pure f32."""
    h = jnp.maximum(x @ params["w1"] + params["b1"], 0.0)
    h = jnp.maximum(h @ params["w2"] + params["b2"], 0.0)
    h = jnp.maximum(h @ params["w3"] + params["b3"], 0.0)
    return h @ params["w4"] + params["b4"]


def reference_forward_bf16(x, padded_params):
    """Same precision path as the kernel (bf16 operands, f32 accumulate), pure JAX."""
    pp = padded_params
    h = x.astype(jnp.bfloat16)
    for i in range(1, 4):
        h = jnp.dot(h, pp[f"w{i}"], preferred_element_type=jnp.float32) + pp[f"b{i}"]
        h = jnp.maximum(h, 0.0).astype(jnp.bfloat16)
    out = jnp.dot(h, pp["w4"], preferred_element_type=jnp.float32) + pp["b4"]
    return out[:, :D_OUT]


if __name__ == "__main__":
    key = jax.random.PRNGKey(0)
    k_params, k_x, k_x2 = jax.random.split(key, 3)
    params = init_params(k_params)
    padded_params = pad_and_cast_params(params)

    # --- Small demo batch (single tile, grid=(1,)) ---
    B = 8
    x = jax.random.normal(k_x, (B, D_IN), jnp.float32)
    out = jax.block_until_ready(classifier2_forward(x, padded_params))
    assert out.shape == (B, D_OUT)

    ref_bf16 = reference_forward_bf16(x, padded_params)
    assert jnp.allclose(out, ref_bf16, atol=2e-3, rtol=2e-3), (
        float(jnp.max(jnp.abs(out - ref_bf16))))
    ref_f32 = reference_forward_f32(x, params)
    assert jnp.allclose(out, ref_f32, atol=2e-2, rtol=2e-2), (
        float(jnp.max(jnp.abs(out - ref_f32))))

    # --- Ragged larger batch: exercises multi-step grid + batch padding path ---
    B2 = 600
    x2 = jax.random.normal(k_x2, (B2, D_IN), jnp.float32)
    out2 = jax.block_until_ready(classifier2_forward(x2, padded_params))
    assert out2.shape == (B2, D_OUT)
    ref2 = reference_forward_bf16(x2, padded_params)
    assert jnp.allclose(out2, ref2, atol=3e-3, rtol=3e-3), (
        float(jnp.max(jnp.abs(out2 - ref2))))

    print("KERNEL_OK")
</pallas_src>

<mosaic_0001>
module attributes {stable_mosaic.version = 11 : i64} {
  func.func @_mlp_kernel(%arg0: i32, %arg1: memref<8x784xf32, #tpu.memory_space<vmem>>, %arg2: memref<784x384xbf16, #tpu.memory_space<vmem>>, %arg3: memref<1x384xf32, #tpu.memory_space<vmem>>, %arg4: memref<384x512xbf16, #tpu.memory_space<vmem>>, %arg5: memref<1x512xf32, #tpu.memory_space<vmem>>, %arg6: memref<512x1024xbf16, #tpu.memory_space<vmem>>, %arg7: memref<1x1024xf32, #tpu.memory_space<vmem>>, %arg8: memref<1024x128xbf16, #tpu.memory_space<vmem>>, %arg9: memref<1x128xf32, #tpu.memory_space<vmem>>, %arg10: memref<8x128xf32, #tpu.memory_space<vmem>>) attributes {dimension_semantics = [#tpu.dimension_semantics<parallel>], iteration_bounds = array<i64: 1>, scalar_prefetch = 0 : i64, scratch_operands = 0 : i64, tpu.core_type = #tpu.core_type<tc>, window_params = [{transform_indices = @transform_0, window_bounds = array<i64: 8, 784>}, {pipeline_mode = #tpu.pipeline_mode<synchronous>, transform_indices = @transform_1, window_bounds = array<i64: 784, 384>}, {pipeline_mode = #tpu.pipeline_mode<synchronous>, transform_indices = @transform_2, window_bounds = array<i64: 1, 384>}, {pipeline_mode = #tpu.pipeline_mode<synchronous>, transform_indices = @transform_3, window_bounds = array<i64: 384, 512>}, {pipeline_mode = #tpu.pipeline_mode<synchronous>, transform_indices = @transform_4, window_bounds = array<i64: 1, 512>}, {pipeline_mode = #tpu.pipeline_mode<synchronous>, transform_indices = @transform_5, window_bounds = array<i64: 512, 1024>}, {pipeline_mode = #tpu.pipeline_mode<synchronous>, transform_indices = @transform_6, window_bounds = array<i64: 1, 1024>}, {pipeline_mode = #tpu.pipeline_mode<synchronous>, transform_indices = @transform_7, window_bounds = array<i64: 1024, 128>}, {pipeline_mode = #tpu.pipeline_mode<synchronous>, transform_indices = @transform_8, window_bounds = array<i64: 1, 128>}, {transform_indices = @transform_9, window_bounds = array<i64: 8, 128>}]} {
    %c0 = arith.constant 0 : index
    %c0_0 = arith.constant 0 : index
    %0 = vector.load %arg1[%c0, %c0_0] : memref<8x784xf32, #tpu.memory_space<vmem>>, vector<8x784xf32>
    %1 = arith.truncf %0 : vector<8x784xf32> to vector<8x784xbf16>
    %c0_1 = arith.constant 0 : index
    %c0_2 = arith.constant 0 : index
    %2 = vector.load %arg2[%c0_1, %c0_2] : memref<784x384xbf16, #tpu.memory_space<vmem>>, vector<784x384xbf16>
    %cst = arith.constant dense<0.000000e+00> : vector<8x384xf32>
    %3 = tpu.matmul %1, %2, %cst {dimension_numbers = #tpu.dot_dimension_numbers<[1], [0], [0], [1], [0, 0, 1, 1], [], []>} : vector<8x784xbf16>, vector<784x384xbf16>, vector<8x384xf32> -> vector<8x384xf32>
    %c0_3 = arith.constant 0 : index
    %c0_4 = arith.constant 0 : index
    %4 = vector.load %arg3[%c0_3, %c0_4] : memref<1x384xf32, #tpu.memory_space<vmem>>, vector<1x384xf32>
    %5 = vector.broadcast %4 : vector<1x384xf32> to vector<8x384xf32>
    %6 = arith.addf %3, %5 : vector<8x384xf32>
    %cst_5 = arith.constant 0.000000e+00 : f32
    %7 = vector.broadcast %cst_5 : f32 to vector<8x384xf32>
    %8 = arith.maximumf %6, %7 : vector<8x384xf32>
    %9 = arith.truncf %8 : vector<8x384xf32> to vector<8x384xbf16>
    %c0_6 = arith.constant 0 : index
    %c0_7 = arith.constant 0 : index
    %10 = vector.load %arg4[%c0_6, %c0_7] : memref<384x512xbf16, #tpu.memory_space<vmem>>, vector<384x512xbf16>
    %cst_8 = arith.constant dense<0.000000e+00> : vector<8x512xf32>
    %11 = tpu.matmul %9, %10, %cst_8 {dimension_numbers = #tpu.dot_dimension_numbers<[1], [0], [0], [1], [0, 0, 1, 1], [], []>} : vector<8x384xbf16>, vector<384x512xbf16>, vector<8x512xf32> -> vector<8x512xf32>
    %c0_9 = arith.constant 0 : index
    %c0_10 = arith.constant 0 : index
    %12 = vector.load %arg5[%c0_9, %c0_10] : memref<1x512xf32, #tpu.memory_space<vmem>>, vector<1x512xf32>
    %13 = vector.broadcast %12 : vector<1x512xf32> to vector<8x512xf32>
    %14 = arith.addf %11, %13 : vector<8x512xf32>
    %cst_11 = arith.constant 0.000000e+00 : f32
    %15 = vector.broadcast %cst_11 : f32 to vector<8x512xf32>
    %16 = arith.maximumf %14, %15 : vector<8x512xf32>
    %17 = arith.truncf %16 : vector<8x512xf32> to vector<8x512xbf16>
    %c0_12 = arith.constant 0 : index
    %c0_13 = arith.constant 0 : index
    %18 = vector.load %arg6[%c0_12, %c0_13] : memref<512x1024xbf16, #tpu.memory_space<vmem>>, vector<512x1024xbf16>
    %cst_14 = arith.constant dense<0.000000e+00> : vector<8x1024xf32>
    %19 = tpu.matmul %17, %18, %cst_14 {dimension_numbers = #tpu.dot_dimension_numbers<[1], [0], [0], [1], [0, 0, 1, 1], [], []>} : vector<8x512xbf16>, vector<512x1024xbf16>, vector<8x1024xf32> -> vector<8x1024xf32>
    %c0_15 = arith.constant 0 : index
    %c0_16 = arith.constant 0 : index
    %20 = vector.load %arg7[%c0_15, %c0_16] : memref<1x1024xf32, #tpu.memory_space<vmem>>, vector<1x1024xf32>
    %21 = vector.broadcast %20 : vector<1x1024xf32> to vector<8x1024xf32>
    %22 = arith.addf %19, %21 : vector<8x1024xf32>
    %cst_17 = arith.constant 0.000000e+00 : f32
    %23 = vector.broadcast %cst_17 : f32 to vector<8x1024xf32>
    %24 = arith.maximumf %22, %23 : vector<8x1024xf32>
    %25 = arith.truncf %24 : vector<8x1024xf32> to vector<8x1024xbf16>
    %c0_18 = arith.constant 0 : index
    %c0_19 = arith.constant 0 : index
    %26 = vector.load %arg8[%c0_18, %c0_19] : memref<1024x128xbf16, #tpu.memory_space<vmem>>, vector<1024x128xbf16>
    %cst_20 = arith.constant dense<0.000000e+00> : vector<8x128xf32>
    %27 = tpu.matmul %25, %26, %cst_20 {dimension_numbers = #tpu.dot_dimension_numbers<[1], [0], [0], [1], [0, 0, 1, 1], [], []>} : vector<8x1024xbf16>, vector<1024x128xbf16>, vector<8x128xf32> -> vector<8x128xf32>
    %c0_21 = arith.constant 0 : index
    %c0_22 = arith.constant 0 : index
    %28 = vector.load %arg9[%c0_21, %c0_22] : memref<1x128xf32, #tpu.memory_space<vmem>>, vector<1x128xf32>
    %29 = vector.broadcast %28 : vector<1x128xf32> to vector<8x128xf32>
    %30 = arith.addf %27, %29 : vector<8x128xf32>
    %c0_23 = arith.constant 0 : index
    %c0_24 = arith.constant 0 : index
    %31 = vector.load %arg10[%c0_23, %c0_24] : memref<8x128xf32, #tpu.memory_space<vmem>>, vector<8x128xf32>
    tpu.vector_store %arg10[%c0_23, %c0_24], %30 {strides = array<i32>} : memref<8x128xf32, #tpu.memory_space<vmem>>, vector<8x128xf32>,
    return
  }
  func.func @transform_0(%arg0: i32) -> (i32, i32) {
    %c0_i32 = arith.constant 0 : i32
    %c0_i32_0 = arith.constant 0 : i32
    return %arg0, %c0_i32 : i32, i32
  }
  func.func @transform_1(%arg0: i32) -> (i32, i32) {
    %c0_i32 = arith.constant 0 : i32
    %c0_i32_0 = arith.constant 0 : i32
    %c0_i32_1 = arith.constant 0 : i32
    return %c0_i32, %c0_i32_0 : i32, i32
  }
  func.func @transform_2(%arg0: i32) -> (i32, i32) {
    %c0_i32 = arith.constant 0 : i32
    %c0_i32_0 = arith.constant 0 : i32
    %c0_i32_1 = arith.constant 0 : i32
    return %c0_i32, %c0_i32_0 : i32, i32
  }
  func.func @transform_3(%arg0: i32) -> (i32, i32) {
    %c0_i32 = arith.constant 0 : i32
    %c0_i32_0 = arith.constant 0 : i32
    %c0_i32_1 = arith.constant 0 : i32
    return %c0_i32, %c0_i32_0 : i32, i32
  }
  func.func @transform_4(%arg0: i32) -> (i32, i32) {
    %c0_i32 = arith.constant 0 : i32
    %c0_i32_0 = arith.constant 0 : i32
    %c0_i32_1 = arith.constant 0 : i32
    return %c0_i32, %c0_i32_0 : i32, i32
  }
  func.func @transform_5(%arg0: i32) -> (i32, i32) {
    %c0_i32 = arith.constant 0 : i32
    %c0_i32_0 = arith.constant 0 : i32
    %c0_i32_1 = arith.constant 0 : i32
    return %c0_i32, %c0_i32_0 : i32, i32
  }
  func.func @transform_6(%arg0: i32) -> (i32, i32) {
    %c0_i32 = arith.constant 0 : i32
    %c0_i32_0 = arith.constant 0 : i32
    %c0_i32_1 = arith.constant 0 : i32
    return %c0_i32, %c0_i32_0 : i32, i32
  }
  func.func @transform_7(%arg0: i32) -> (i32, i32) {
    %c0_i32 = arith.constant 0 : i32
    %c0_i32_0 = arith.constant 0 : i32
    %c0_i32_1 = arith.constant 0 : i32
    return %c0_i32, %c0_i32_0 : i32, i32
  }
  func.func @transform_8(%arg0: i32) -> (i32, i32) {
    %c0_i32 = arith.constant 0 : i32
    %c0_i32_0 = arith.constant 0 : i32
    %c0_i32_1 = arith.constant 0 : i32
    return %c0_i32, %c0_i32_0 : i32, i32
  }
  func.func @transform_9(%arg0: i32) -> (i32, i32) {
    %c0_i32 = arith.constant 0 : i32
    %c0_i32_0 = arith.constant 0 : i32
    return %arg0, %c0_i32 : i32, i32
  }
}

</mosaic_0001>

<bundles_post_ra>
// kernel: tpu_custom_call.1
= control target key start
LH: loop header
LB: loop body
LE: loop exit
PB: predicated region body
PF: predicated region fallthrough
CT: control target
= control target key end

     0   :  { %14 = vsyncpa [#allocation3], 0  ;;  %s6427_s0 = inlined_call_operand.hbm [shape: f32[8,784], index: 0, kind: input, shape index: {}]   ;;  %s6428_s1 = inlined_call_operand.hbm [shape: bf16[784,384], index: 1, kind: input, shape index: {}]   ;;  %s6429_s2 = inlined_call_operand.vmem [shape: f32[1,384], index: 2, kind: input, shape index: {}]   ;;  %s6430_s3 = inlined_call_operand.hbm [shape: bf16[384,512], index: 3, kind: input, shape index: {}]   ;;  %s6431_s4 = inlined_call_operand.vmem [shape: f32[1,512], index: 4, kind: input, shape index: {}]   ;;  %s6432_s5 = inlined_call_operand.hbm [shape: bf16[512,1024], index: 5, kind: input, shape index: {}]   ;;  %s6433_s6 = inlined_call_operand.vmem [shape: f32[1,1024], index: 6, kind: input, shape index: {}]   ;;  %s6434_s7 = inlined_call_operand.hbm [shape: bf16[1024,128], index: 7, kind: input, shape index: {}]   ;;  %s6435_s8 = inlined_call_operand.vmem [shape: f32[1,128], index: 8, kind: input, shape index: {}]   ;;  %s6436_s9 = inlined_call_operand.hbm [shape: f32[8,128], index: 9, kind: output, shape index: {}]  }
   0x1   :  { %15 = vsyncpa [#allocation6], 0 }
   0x2   :  { %16 = vsyncpa [#allocation9], 0 }
   0x3   :  { %17 = vsyncpa [#allocation4], 0  ;;  %s6171_s30 = smov [#allocation5]   ;;  %s6031_s13 = scalar_lea.hbm %s6428_s1, 18816 }
   0x4   :  { %s33_s10 = sshll.u32 %s6171_s30, 4  ;;  %p6032_p0 = scmp.ne.s32.totalorder %s6428_s1, %s6031_s13  ;;  %s34_s10 = int_to_ptr.vmem [resolvable:$true] %s33_s10 }
   0x5   :  { %p6035_p1 = scmp.lt.u32.totalorder %s6031_s13, %s6428_s1 }
   0x7   :  { %p6037_p2 = pnand %p6035_p1, %p6032_p0 }
   0x9   :  { %6040 = shalt.err (!%p6037_p2)
}
   0xa   :  { %s6041_s18 = scalar_lea.vmem %s34_s10, 18816  ;;  %p6046_p4 = scmp.lt.s32.totalorder %s34_s10, %s34_s10 }
   0xb   :  { %p6042_p3 = scmp.ne.s32.totalorder %s34_s10, %s6041_s18  ;;  %p6047_p5 = scmp.lt.s32.totalorder %s6041_s18, %s6041_s18 }
   0xd   :  { %p6048_p6 = por %p6047_p5, %p6046_p4 }
   0xf   :  { %p6049_p7 = pnand %p6048_p6, %p6042_p3 }
  0x11   :  { %6052 = shalt.err (!%p6049_p7)
}
  0x12   :  { %s6172_s19 = smov 192   ;;  %s6173_s20 = smov 12  }
  0x13   :  { %39 = dma.hbm_to_vmem [thread:$0]  %s6428_s1, 18816, %s34_s10, [#allocation6], %s6172_s19, %s6172_s19, %s6173_s20  }
  0x14   :  { %s6174_s23 = smov [#allocation8]   ;;  %s6053_s27 = scalar_lea.hbm %s6432_s5, 32768 }
  0x15   :  { %s61_s24 = sshll.u32 %s6174_s23, 4  ;;  %p6054_p8 = scmp.ne.s32.totalorder %s6432_s5, %s6053_s27  ;;  %s62_s24 = int_to_ptr.vmem [resolvable:$true] %s61_s24 }
  0x16   :  { %p6057_p9 = scmp.lt.u32.totalorder %s6053_s27, %s6432_s5 }
  0x18   :  { %p6059_p10 = pnand %p6057_p9, %p6054_p8 }
  0x1a   :  { %6062 = shalt.err (!%p6059_p10)
}
  0x1b   :  { %s6063_s12 = scalar_lea.vmem %s62_s24, 32768  ;;  %p6068_p12 = scmp.lt.s32.totalorder %s62_s24, %s62_s24 }
  0x1c   :  { %p6064_p11 = scmp.ne.s32.totalorder %s62_s24, %s6063_s12  ;;  %p6069_p13 = scmp.lt.s32.totalorder %s6063_s12, %s6063_s12 }
  0x1e   :  { %p6070_p0 = por %p6069_p13, %p6068_p12 }
  0x20   :  { %p6071_p1 = pnand %p6070_p0, %p6064_p11 }
  0x22   :  { %6074 = shalt.err (!%p6071_p1)
}
  0x23   :  { %s6175_s1 = smov 512   ;;  %s6176_s10 = smov 32  }
  0x24   :  { %67 = dma.hbm_to_vmem [thread:$0]  %s6432_s5, 32768, %s62_s24, [#allocation9], %s6175_s1, %s6175_s1, %s6176_s10  }
  0x25   :  { %s6177_s15 = smov [#allocation2]   ;;  %s6178_s17 = smov [#allocation7]  }
  0x26   :  { %s24_s16 = sshll.u32 %s6177_s15, 4  ;;  %s47_s18 = sshll.u32 %s6178_s17, 4  ;;  %s25_s16 = int_to_ptr.vmem [resolvable:$true] %s24_s16  ;;  %s6262_s18 = int_to_ptr.vmem [resolvable:$true] %s47_s18 }
  0x27   :  { %s6075_s21 = scalar_lea.hbm %s6427_s0, 896 }
  0x28   :  { %p6076_p2 = scmp.ne.s32.totalorder %s6427_s0, %s6075_s21  ;;  %p6079_p3 = scmp.lt.u32.totalorder %s6075_s21, %s6427_s0 }
  0x2a   :  { %p6081_p4 = pnand %p6079_p3, %p6076_p2 }
  0x2c   :  { %6084 = shalt.err (!%p6081_p4)
}
  0x2d   :  { %s6085_s5 = scalar_lea.vmem %s25_s16, 896  ;;  %p6090_p6 = scmp.lt.s32.totalorder %s25_s16, %s25_s16 }
  0x2e   :  { %p6086_p5 = scmp.ne.s32.totalorder %s25_s16, %s6085_s5  ;;  %p6091_p7 = scmp.lt.s32.totalorder %s6085_s5, %s6085_s5 }
  0x30   :  { %p6092_p8 = por %p6091_p7, %p6090_p6 }
  0x32   :  { %p6093_p9 = pnand %p6092_p8, %p6086_p5 }
  0x34   :  { %6096 = shalt.err (!%p6093_p9)
}
  0x35   :  { %27 = dma.hbm_to_vmem [thread:$0]  %s6427_s0, 896, %s25_s16, [#allocation3]  }
  0x36   :  { %s6097_s30 = scalar_lea.hbm %s6430_s3, 12288 }
  0x37   :  { %p6098_p10 = scmp.ne.s32.totalorder %s6430_s3, %s6097_s30  ;;  %p6101_p11 = scmp.lt.u32.totalorder %s6097_s30, %s6430_s3 }
  0x39   :  { %p6103_p12 = pnand %p6101_p11, %p6098_p10 }
  0x3b   :  { %6106 = shalt.err (!%p6103_p12)
}
  0x3c   :  { %s6107_s13 = scalar_lea.vmem %s6262_s18, 12288  ;;  %p6112_p0 = scmp.lt.s32.totalorder %s6262_s18, %s6262_s18 }
  0x3d   :  { %p6108_p13 = scmp.ne.s32.totalorder %s6262_s18, %s6107_s13  ;;  %p6113_p1 = scmp.lt.s32.totalorder %s6107_s13, %s6107_s13 }
  0x3f   :  { %p6114_p2 = por %p6113_p1, %p6112_p0 }
  0x41   :  { %p6115_p3 = pnand %p6114_p2, %p6108_p13 }
  0x43   :  { %6118 = shalt.err (!%p6115_p3)
}
  0x44   :  { %s6179_s0 = smov 256   ;;  %s6180_s14 = smov 16  }
  0x45   :  { %53 = dma.hbm_to_vmem [thread:$0]  %s6430_s3, 12288, %s6262_s18, [#allocation6], %s6179_s0, %s6179_s0, %s6180_s14  }
  0x46   :  { %s6181_s17 = smov [#allocation10]   ;;  %s6119_s22 = scalar_lea.hbm %s6434_s7, 8192 }
  0x47   :  { %s75_s19 = sshll.u32 %s6181_s17, 4  ;;  %p6120_p4 = scmp.ne.s32.totalorder %s6434_s7, %s6119_s22  ;;  %s76_s19 = int_to_ptr.vmem [resolvable:$true] %s75_s19 }
  0x48   :  { %p6123_p5 = scmp.lt.u32.totalorder %s6119_s22, %s6434_s7 }
  0x4a   :  { %p6125_p6 = pnand %p6123_p5, %p6120_p4 }
  0x4c   :  { %6128 = shalt.err (!%p6125_p6)
}
  0x4d   :  { %s6129_s24 = scalar_lea.vmem %s76_s19, 8192  ;;  %p6134_p8 = scmp.lt.s32.totalorder %s76_s19, %s76_s19 }
  0x4e   :  { %p6130_p7 = scmp.ne.s32.totalorder %s76_s19, %s6129_s24  ;;  %p6135_p9 = scmp.lt.s32.totalorder %s6129_s24, %s6129_s24 }
  0x50   :  { %p6136_p10 = por %p6135_p9, %p6134_p8 }
  0x52   :  { %p6137_p11 = pnand %p6136_p10, %p6130_p7 }
  0x54   :  { %6140 = shalt.err (!%p6137_p11)
}
  0x55   :  { %s6182_s3 = smov 64   ;;  %s6183_s18 = smov 4  }
  0x56   :  { %81 = dma.hbm_to_vmem [thread:$0]  %s6434_s7, 8192, %s76_s19, [#allocation9], %s6182_s3, %s6182_s3, %s6183_s18  }
  0x57   :  { %6163 = dma.done.wait [#allocation3], 896  }
  0x58   :  { %6164 = vsyncadd [#allocation3], 4294966400 }
  0x59   :  { %6165 = dma.done.wait [#allocation6], 31104  }
  0x5a   :  { %6166 = vsyncadd [#allocation6], 4294936192 }
  0x5b   :  { %6167 = dma.done.wait [#allocation9], 40960  }
  0x5c   :  { %6168 = vsyncadd [#allocation9], 4294926336  ;;  %v6184_v0 = vmov 0   ;;  %v5627_v1 = vld [vmem:[#allocation5 + $0x4] ss:$12 sps:$4 sm:$0xff]   ;;  %v106_v18 = vld [vmem:[#allocation2 + $0x30] sm:$0xff] }
  0x5d   :  { %1270 = vmatprep.mubr.bf16.mxu1 %v6184_v0  ;;  %v5629_v2 = vld [vmem:[#allocation5] ss:$12 sps:$4 sm:$0xff]   ;;  %1115 = vmatprep.subr.bf16.mxu0 %v5627_v1  ;;  %v5630_v3 = vld [vmem:[#allocation5 + $0x1c] ss:$12 sps:$4 sm:$0xff]   ;;  %v5632_v4 = vld [vmem:[#allocation5 + $0x18] ss:$12 sps:$4 sm:$0xff]   ;;  %v6306_v20 = vpack.c.bf16 %v106_v18, %v106_v18 }
  0x5e   :  { %1116 = vmatpush1.bf16.msra.mxu0 %v5629_v2  ;;  %v5633_v5 = vld [vmem:[#allocation5 + $0x34] ss:$12 sps:$4 sm:$0xff]   ;;  %v5635_v6 = vld [vmem:[#allocation5 + $0x30] ss:$12 sps:$4 sm:$0xff]   ;;  %v5636_v7 = vld [vmem:[#allocation5 + $0x4c] ss:$12 sps:$4 sm:$0xff]  }
  0x5f   :  { %1117 = vmatprep.subr.bf16.mxu0 %v5630_v3  ;;  %v5638_v8 = vld [vmem:[#allocation5 + $0x48] ss:$12 sps:$4 sm:$0xff]   ;;  %v5639_v9 = vld [vmem:[#allocation5 + $0x64] ss:$12 sps:$4 sm:$0xff]   ;;  %v5641_v10 = vld [vmem:[#allocation5 + $0x60] ss:$12 sps:$4 sm:$0xff]  }
  0x60   :  { %v5642_v11 = vld [vmem:[#allocation5 + $0x7c] ss:$12 sps:$4 sm:$0xff]   ;;  %v5644_v12 = vld [vmem:[#allocation5 + $0x78] ss:$12 sps:$4 sm:$0xff]   ;;  %v5645_v14 = vld [vmem:[#allocation5 + $0x94] ss:$12 sps:$4 sm:$0xff]  }
  0x61   :  { %v5669_v13 = vld [vmem:[#allocation5 + $0x484] ss:$12 sps:$4 sm:$0xff]   ;;  %v5673_v15 = vld [vmem:[#allocation5 + $0x480] ss:$12 sps:$4 sm:$0xff]   ;;  %v5675_v16 = vld [vmem:[#allocation5 + $0xc8] ss:$12 sps:$4 sm:$0xff]  }
  0x62   :  { %1118 = vmatpush1.bf16.msra.mxu0 %v5632_v4  ;;  %1238 = vmatprep.subr.bf16.mxu1 %v5669_v13  ;;  %v5647_v17 = vld [vmem:[#allocation5 + $0x90] ss:$12 sps:$4 sm:$0xff]   ;;  %vm1111_vm0 = vcmask 130048   ;;  %v5648_v19 = vld [vmem:[#allocation5 + $0xac] ss:$12 sps:$4 sm:$0xff]   ;;  %vm6186_vm1 = vmmov 0  }
  0x63   :  { %1119 = vmatprep.subr.bf16.mxu0 %v5633_v5  ;;  %1239 = vmatpush1.bf16.msra.mxu1 %v5673_v15  ;;  %v5678_v21 = vld [vmem:[#allocation5 + $0x8] ss:$12 sps:$4 sm:$0xff]   ;;  %v5680_v22 = vld [vmem:[#allocation5 + $0xe0] ss:$12 sps:$4 sm:$0xff]   ;;  %v5651_v26 = vld [vmem:[#allocation5 + $0xc4] ss:$12 sps:$4 sm:$0xff]  }
  0x64   :  { %5400 = vmatprep.subr.bf16.mxu1 %v5675_v16  ;;  %v101_v23 = vld [vmem:[#allocation2 + $0x8] sm:$0xff]  ;;  %v5684_v27 = vld [vmem:[#allocation5 + $0x20] ss:$12 sps:$4 sm:$0xff]   ;;  %v5685_v28 = vld [vmem:[#allocation5 + $0xf8] ss:$12 sps:$4 sm:$0xff]   ;;  %s6187_s1 = smov [#allocation11]  }
  0x65   :  { %v5650_v24 = vld [vmem:[#allocation5 + $0xa8] ss:$12 sps:$4 sm:$0xff]   ;;  %v108_v25 = vpack.c.bf16 %v101_v23, %v101_v23  ;;  %v5653_v29 = vld [vmem:[#allocation5 + $0xc0] ss:$12 sps:$4 sm:$0xff]   ;;  %v5689_v31 = vld [vmem:[#allocation5 + $0x38] ss:$12 sps:$4 sm:$0xff]  }
  0x66   :  { %1120 = vmatpush1.bf16.msra.mxu0 %v5635_v6  ;;  %4981 = vmatmul.mubr.msk.bf16.vlgmr.msra.gmra.mrb[0].mxu1 %vm1111_vm0, %v6306_v20  ;;  %v5654_v30 = vld [vmem:[#allocation5 + $0xdc] ss:$12 sps:$4 sm:$0xff]   ;;  %v5656_v33 = vld [vmem:[#allocation5 + $0xd8] ss:$12 sps:$4 sm:$0xff]   ;;  %v5657_v34 = vld [vmem:[#allocation5 + $0xf4] ss:$12 sps:$4 sm:$0xff]  }
  0x67   :  { %1121 = vmatprep.subr.bf16.mxu0 %v5636_v7  ;;  %5401 = vmatpush3.bf16.msra.mxu1 %v5678_v21  ;;  %v5690_v32 = vld [vmem:[#allocation5 + $0x110] ss:$12 sps:$4 sm:$0xff]   ;;  %v5695_v36 = vld [vmem:[#allocation5 + $0x128] ss:$12 sps:$4 sm:$0xff]   ;;  %v5660_v38 = vld [vmem:[#allocation5 + $0x10c] ss:$12 sps:$4 sm:$0xff]  }
  0x68   :  { %5402 = vmatprep.subr.bf16.mxu1 %v5680_v22  ;;  %1147 = vmatprep.mubr.bf16.mxu0 %v108_v25  ;;  %v5694_v35 = vld [vmem:[#allocation5 + $0x50] ss:$12 sps:$4 sm:$0xff]   ;;  %v5699_v39 = vld [vmem:[#allocation5 + $0x68] ss:$12 sps:$4 sm:$0xff]   ;;  %v5700_v40 = vld [vmem:[#allocation5 + $0x140] ss:$12 sps:$4 sm:$0xff]  }
  0x69   :  { %1311 = vmatprep.mubr.bf16.mxu1 %v108_v25  ;;  %v5659_v37 = vld [vmem:[#allocation5 + $0xf0] ss:$12 sps:$4 sm:$0xff]   ;;  %v5662_v41 = vld [vmem:[#allocation5 + $0x108] ss:$12 sps:$4 sm:$0xff]   ;;  %v5704_v42 = vld [vmem:[#allocation5 + $0x80] ss:$12 sps:$4 sm:$0xff]  }
  0x6a   :  { %1122 = vmatpush1.bf16.msra.mxu0 %v5638_v8  ;;  %v5663_v43 = vld [vmem:[#allocation5 + $0x124] ss:$12 sps:$4 sm:$0xff]   ;;  %v5665_v45 = vld [vmem:[#allocation5 + $0x120] ss:$12 sps:$4 sm:$0xff]   ;;  %v5666_v46 = vld [vmem:[#allocation5 + $0x13c] ss:$12 sps:$4 sm:$0xff]  }
  0x6b   :  { %1123 = vmatprep.subr.bf16.mxu0 %v5639_v9  ;;  %5403 = vmatpush3.bf16.msra.mxu1 %v5684_v27  ;;  %v5705_v44 = vld [vmem:[#allocation5 + $0x158] ss:$12 sps:$4 sm:$0xff]   ;;  %v5710_v48 = vld [vmem:[#allocation5 + $0x170] ss:$12 sps:$4 sm:$0xff]   ;;  %v5671_v50 = vld [vmem:[#allocation5 + $0x154] ss:$12 sps:$4 sm:$0xff]  }
  0x6c   :  { %5404 = vmatprep.subr.bf16.mxu1 %v5685_v28  ;;  %v5709_v47 = vld [vmem:[#allocation5 + $0x98] ss:$12 sps:$4 sm:$0xff]   ;;  %v5714_v51 = vld [vmem:[#allocation5 + $0xb0] ss:$12 sps:$4 sm:$0xff]   ;;  %v5715_v52 = vld [vmem:[#allocation5 + $0x248] ss:$12 sps:$4 sm:$0xff]  }
  0x6d   :  { %v5668_v49 = vld [vmem:[#allocation5 + $0x138] ss:$12 sps:$4 sm:$0xff]   ;;  %v100_v53 = vld [vmem:[#allocation2] sm:$0xff]  ;;  %v5674_v54 = vld [vmem:[#allocation5 + $0x150] ss:$12 sps:$4 sm:$0xff]   ;;  %s4823_s10 = sshll.u32 %s6187_s1, 4  ;;  %s4824_s10 = int_to_ptr.vmem [resolvable:$true] %s4823_s10 }
  0x6e   :  { %1124 = vmatpush1.bf16.msra.mxu0 %v5641_v10  ;;  %v5676_v55 = vld [vmem:[#allocation5 + $0x16c] ss:$12 sps:$4 sm:$0xff]   ;;  %v5719_v56 = vld [vmem:[#allocation5 + $0x188] ss:$12 sps:$4 sm:$0xff]   ;;  %v107_v57 = vpack.c.bf16 %v100_v53, %v100_v53  ;;  %v5683_v60 = vld [vmem:[#allocation5 + $0x184] ss:$12 sps:$4 sm:$0xff]   ;;  %p6146_p13 = scmp.lt.s32.totalorder %s4824_s10, %s4824_s10 }
  0x6f   :  { %1125 = vmatprep.subr.bf16.mxu0 %v5642_v11  ;;  %5405 = vmatpush3.bf16.msra.mxu1 %v5689_v31  ;;  %v5720_v58 = vld [vmem:[#allocation5 + $0x260] ss:$12 sps:$4 sm:$0xff]   ;;  %v5679_v59 = vld [vmem:[#allocation5 + $0x168] ss:$12 sps:$4 sm:$0xff]   ;;  %v5725_v62 = vld [vmem:[#allocation5 + $0x278] ss:$12 sps:$4 sm:$0xff]  }
  0x70   :  { %5406 = vmatprep.subr.bf16.mxu1 %v5690_v32  ;;  %v5724_v61 = vld [vmem:[#allocation5 + $0x1a0] ss:$12 sps:$4 sm:$0xff]   ;;  %v5729_v1 = vld [vmem:[#allocation5 + $0x1b8] ss:$12 sps:$4 sm:$0xff]   ;;  %v5688_v2 = vld [vmem:[#allocation5 + $0x19c] ss:$12 sps:$4 sm:$0xff]  }
  0x71   :  { %v5681_v63 = vld [vmem:[#allocation5 + $0x180] ss:$12 sps:$4 sm:$0xff]   ;;  %v5730_v3 = vld [vmem:[#allocation5 + $0x290] ss:$12 sps:$4 sm:$0xff]   ;;  %v5686_v4 = vld [vmem:[#allocation5 + $0x198] ss:$12 sps:$4 sm:$0xff]  }
  0x72   :  { %1126 = vmatpush1.bf16.msra.mxu0 %v5644_v12  ;;  %v5693_v5 = vld [vmem:[#allocation5 + $0x1b4] ss:$12 sps:$4 sm:$0xff]   ;;  %v5734_v6 = vld [vmem:[#allocation5 + $0x1d0] ss:$12 sps:$4 sm:$0xff]   ;;  %v5698_v9 = vld [vmem:[#allocation5 + $0x1cc] ss:$12 sps:$4 sm:$0xff]  }
  0x73   :  { %1127 = vmatprep.subr.bf16.mxu0 %v5645_v14  ;;  %5407 = vmatpush3.bf16.msra.mxu1 %v5694_v35  ;;  %v5735_v7 = vld [vmem:[#allocation5 + $0x2a8] ss:$12 sps:$4 sm:$0xff]   ;;  %v5691_v8 = vld [vmem:[#allocation5 + $0x1b0] ss:$12 sps:$4 sm:$0xff]   ;;  %v5740_v11 = vld [vmem:[#allocation5 + $0x2c0] ss:$12 sps:$4 sm:$0xff]  }
  0x74   :  { %5408 = vmatprep.subr.bf16.mxu1 %v5695_v36  ;;  %v5739_v10 = vld [vmem:[#allocation5 + $0x1e8] ss:$12 sps:$4 sm:$0xff]   ;;  %v5703_v13 = vld [vmem:[#allocation5 + $0x1e4] ss:$12 sps:$4 sm:$0xff]   ;;  %v5744_v14 = vld [vmem:[#allocation5 + $0x200] ss:$12 sps:$4 sm:$0xff]  }
  0x75   :  { %v5696_v12 = vld [vmem:[#allocation5 + $0x1c8] ss:$12 sps:$4 sm:$0xff]   ;;  %v103_v15 = vld [vmem:[#allocation2 + $0x18] sm:$0xff]  ;;  %v5750_v22 = vld [vmem:[#allocation5 + $0x2f0] ss:$12 sps:$4 sm:$0xff]  }
  0x76   :  { %1128 = vmatpush1.bf16.msra.mxu0 %v5647_v17  ;;  %v5745_v16 = vld [vmem:[#allocation5 + $0x2d8] ss:$12 sps:$4 sm:$0xff]   ;;  %v110_v17 = vpack.c.bf16 %v103_v15, %v103_v15  ;;  %v5701_v18 = vld [vmem:[#allocation5 + $0x1e0] ss:$12 sps:$4 sm:$0xff]   ;;  %v5754_v25 = vld [vmem:[#allocation5 + $0x230] ss:$12 sps:$4 sm:$0xff]  }
  0x77   :  { %1129 = vmatprep.subr.bf16.mxu0 %v5648_v19  ;;  %5409 = vmatpush3.bf16.msra.mxu1 %v5699_v39  ;;  %v5708_v19 = vld [vmem:[#allocation5 + $0x1fc] ss:$12 sps:$4 sm:$0xff]   ;;  %v5749_v21 = vld [vmem:[#allocation5 + $0x218] ss:$12 sps:$4 sm:$0xff]   ;;  %v5760_v32 = vld [vmem:[#allocation5 + $0x3e0] ss:$12 sps:$4 sm:$0xff]  }
  0x78   :  { %5410 = vmatprep.subr.bf16.mxu1 %v5700_v40  ;;  %v5706_v23 = vld [vmem:[#allocation5 + $0x1f8] ss:$12 sps:$4 sm:$0xff]   ;;  %v5755_v27 = vld [vmem:[#allocation5 + $0x3c8] ss:$12 sps:$4 sm:$0xff]   ;;  %v5711_v28 = vld [vmem:[#allocation5 + $0x210] ss:$12 sps:$4 sm:$0xff]  }
  0x79   :  { %v5718_v31 = vld [vmem:[#allocation5 + $0x22c] ss:$12 sps:$4 sm:$0xff]   ;;  %v5770_v40 = vld [vmem:[#allocation5 + $0x410] ss:$12 sps:$4 sm:$0xff]  }
  0x7a   :  { %1130 = vmatpush1.bf16.msra.mxu0 %v5650_v24  ;;  %v5713_v24 = vld [vmem:[#allocation5 + $0x214] ss:$12 sps:$4 sm:$0xff]   ;;  %v5765_v36 = vld [vmem:[#allocation5 + $0x3f8] ss:$12 sps:$4 sm:$0xff]   ;;  %v5837_v15 = vld [vmem:[#allocation7 + $0x44] ss:$16 sps:$4 sm:$0xff]  }
  0x7b   :  { %1131 = vmatprep.subr.bf16.mxu0 %v5651_v26  ;;  %5411 = vmatpush3.bf16.msra.mxu1 %v5704_v42  ;;  %v102_v26 = vld [vmem:[#allocation2 + $0x10] sm:$0xff]  ;;  %v5764_v35 = vld [vmem:[#allocation5 + $0x320] ss:$12 sps:$4 sm:$0xff]   ;;  %v5743_v53 = vld [vmem:[#allocation5 + $0x2a4] ss:$12 sps:$4 sm:$0xff]  }
  0x7c   :  { %5412 = vmatprep.subr.bf16.mxu1 %v5705_v44  ;;  %v5769_v39 = vld [vmem:[#allocation5 + $0x338] ss:$12 sps:$4 sm:$0xff]   ;;  %v5733_v42 = vld [vmem:[#allocation5 + $0x274] ss:$12 sps:$4 sm:$0xff]  }
  0x7d   :  { %v5775_v44 = vld [vmem:[#allocation5 + $0x428] ss:$12 sps:$4 sm:$0xff]  }
  0x7e   :  { %1132 = vmatpush1.bf16.msra.mxu0 %v5653_v29  ;;  %v6310_v29 = vpack.c.bf16 %v102_v26, %v102_v26  ;;  %v5793_v26 = vld [vmem:[#allocation5 + $0x394] ss:$12 sps:$4 sm:$0xff]  }
  0x7f   :  { %1133 = vmatprep.subr.bf16.mxu0 %v5654_v30  ;;  %5413 = vmatpush3.bf16.msra.mxu1 %v5709_v47  ;;  %v5759_v30 = vld [vmem:[#allocation5 + $0x308] ss:$12 sps:$4 sm:$0xff]  }
  0x80   :  { %5414 = vmatprep.subr.bf16.mxu1 %v5710_v48  ;;  %v105_v47 = vld [vmem:[#allocation2 + $0x28] sm:$0xff]  ;;  %v5738_v48 = vld [vmem:[#allocation5 + $0x28c] ss:$12 sps:$4 sm:$0xff]  }
  0x82   :  { %1134 = vmatpush1.bf16.msra.mxu0 %v5656_v33  ;;  %v5716_v33 = vld [vmem:[#allocation5 + $0x228] ss:$12 sps:$4 sm:$0xff]  }
  0x83   :  { %1135 = vmatprep.subr.bf16.mxu0 %v5657_v34  ;;  %5415 = vmatpush3.bf16.msra.mxu1 %v5714_v51  ;;  %v5723_v34 = vld [vmem:[#allocation5 + $0x244] ss:$12 sps:$4 sm:$0xff]   ;;  %v5736_v51 = vld [vmem:[#allocation5 + $0x288] ss:$12 sps:$4 sm:$0xff]  }
  0x84   :  { %5422 = vmatprep.subr.bf16.mxu1 %v5715_v52  ;;  %v5784_v52 = vld [vmem:[#allocation5 + $0x380] ss:$12 sps:$4 sm:$0xff]  }
  0x86   :  { %1136 = vmatpush1.bf16.msra.mxu0 %v5659_v37  ;;  %1312 = vmatmul.mubr.bf16.vlgmr.msra.gmra.mrb[4].mxu1 %v107_v57  ;;  %v5721_v37 = vld [vmem:[#allocation5 + $0x240] ss:$12 sps:$4 sm:$0xff]  }
  0x87   :  { %1137 = vmatprep.subr.bf16.mxu0 %v5660_v38  ;;  %5423 = vmatpush3.bf16.msra.mxu1 %v5719_v56  ;;  %v5728_v38 = vld [vmem:[#allocation5 + $0x25c] ss:$12 sps:$4 sm:$0xff]   ;;  %v5789_v56 = vld [vmem:[#allocation5 + $0x398] ss:$12 sps:$4 sm:$0xff]  }
  0x88   :  { %5424 = vmatprep.subr.bf16.mxu1 %v5720_v58  ;;  %1351 = vmatprep.mubr.bf16.mxu1 %v110_v17  ;;  %v5790_v58 = vld [vmem:[#allocation5 + $0x470] ss:$12 sps:$4 sm:$0xff]  }
  0x8a   :  { %1138 = vmatpush1.bf16.msra.mxu0 %v5662_v41  ;;  %v5726_v41 = vld [vmem:[#allocation5 + $0x258] ss:$12 sps:$4 sm:$0xff]  }
  0x8b   :  { %1139 = vmatprep.subr.bf16.mxu0 %v5663_v43  ;;  %5425 = vmatpush3.bf16.msra.mxu1 %v5724_v61  ;;  %v5774_v43 = vld [vmem:[#allocation5 + $0x350] ss:$12 sps:$4 sm:$0xff]   ;;  %v104_v61 = vld [vmem:[#allocation2 + $0x20] sm:$0xff] }
  0x8c   :  { %5426 = vmatprep.subr.bf16.mxu1 %v5725_v62  ;;  %v5753_v62 = vld [vmem:[#allocation5 + $0x2d4] ss:$12 sps:$4 sm:$0xff]  }
  0x8e   :  { %1140 = vmatpush1.bf16.msra.mxu0 %v5665_v45  ;;  %v5731_v45 = vld [vmem:[#allocation5 + $0x270] ss:$12 sps:$4 sm:$0xff]  }
  0x8f   :  { %1141 = vmatprep.subr.bf16.mxu0 %v5666_v46  ;;  %5427 = vmatpush3.bf16.msra.mxu1 %v5729_v1  ;;  %v5779_v46 = vld [vmem:[#allocation5 + $0x368] ss:$12 sps:$4 sm:$0xff]   ;;  %v6313_v1 = vpack.c.bf16 %v104_v61, %v104_v61 }
  0x90   :  { %5428 = vmatprep.subr.bf16.mxu1 %v5730_v3  ;;  %v5758_v3 = vld [vmem:[#allocation5 + $0x2ec] ss:$12 sps:$4 sm:$0xff]  }
  0x91   :  { %v5859_v61 = vld [vmem:[#allocation7 + $0xc0] ss:$16 sps:$4 sm:$0xff]  }
  0x92   :  { %1142 = vmatpush1.bf16.msra.mxu0 %v5668_v49  ;;  %v5780_v49 = vld [vmem:[#allocation5 + $0x440] ss:$12 sps:$4 sm:$0xff]  }
  0x93   :  { %1143 = vmatprep.subr.bf16.mxu0 %v5671_v50  ;;  %5429 = vmatpush3.bf16.msra.mxu1 %v5734_v6  ;;  %v112_v50 = vpack.c.bf16 %v105_v47, %v105_v47  ;;  %v5756_v6 = vld [vmem:[#allocation5 + $0x2e8] ss:$12 sps:$4 sm:$0xff]  }
  0x94   :  { %5430 = vmatprep.subr.bf16.mxu1 %v5735_v7  ;;  %v5763_v7 = vld [vmem:[#allocation5 + $0x304] ss:$12 sps:$4 sm:$0xff]   ;;  %v5820_v47 = vld [vmem:[#allocation5 + $0x468] ss:$12 sps:$4 sm:$0xff]  }
  0x96   :  { %1144 = vmatpush1.bf16.msra.mxu0 %v5674_v54  ;;  %v5785_v54 = vld [vmem:[#allocation5 + $0x458] ss:$12 sps:$4 sm:$0xff]  }
  0x97   :  { %1145 = vmatprep.subr.bf16.mxu0 %v5676_v55  ;;  %5431 = vmatpush3.bf16.msra.mxu1 %v5739_v10  ;;  %v5741_v55 = vld [vmem:[#allocation5 + $0x2a0] ss:$12 sps:$4 sm:$0xff]   ;;  %v5823_v10 = vld [vmem:[#allocation7] ss:$16 sps:$4 sm:$0xff]  }
  0x98   :  { %5432 = vmatprep.subr.bf16.mxu1 %v5740_v11  ;;  %v5831_v11 = vld [vmem:[#allocation7 + $0x24] ss:$16 sps:$4 sm:$0xff]  }
  0x9a   :  { %1146 = vmatpush1.bf16.msra.mxu0 %v5679_v59  ;;  %v5746_v59 = vld [vmem:[#allocation5 + $0x2b8] ss:$12 sps:$4 sm:$0xff]  }
  0x9b   :  { %1156 = vmatprep.subr.bf16.mxu0 %v5683_v60  ;;  %5433 = vmatpush3.bf16.msra.mxu1 %v5744_v14  ;;  %v5794_v60 = vld [vmem:[#allocation5 + $0x3b0] ss:$12 sps:$4 sm:$0xff]   ;;  %v5829_v14 = vld [vmem:[#allocation7 + $0x20] ss:$16 sps:$4 sm:$0xff]  }
  0x9c   :  { %5434 = vmatprep.subr.bf16.mxu1 %v5745_v16  ;;  %v5771_v16 = vld [vmem:[#allocation5 + $0x330] ss:$12 sps:$4 sm:$0xff]  }
  0x9d   :  { %1148 = vmatmul.mubr.bf16.vlgmr.msra.gmra.mrb[0].mxu0 %v107_v57  ;;  %v5748_v57 = vld [vmem:[#allocation5 + $0x2bc] ss:$12 sps:$4 sm:$0xff]  }
  0x9e   :  { %1157 = vmatpush1.bf16.msra.mxu0 %v5681_v63  ;;  %1188 = vmatprep.mubr.bf16.mxu0 %v110_v17  ;;  %v5751_v63 = vld [vmem:[#allocation5 + $0x2d0] ss:$12 sps:$4 sm:$0xff]   ;;  %v5778_v17 = vld [vmem:[#allocation5 + $0x34c] ss:$12 sps:$4 sm:$0xff]  }
  0x9f   :  { %1158 = vmatprep.subr.bf16.mxu0 %v5688_v2  ;;  %5435 = vmatpush3.bf16.msra.mxu1 %v5749_v21  ;;  %v5801_v2 = vld [vmem:[#allocation5 + $0x488] ss:$12 sps:$4 sm:$0xff]   ;;  %v5783_v21 = vld [vmem:[#allocation5 + $0x364] ss:$12 sps:$4 sm:$0xff]  }
  0xa0   :  { %5436 = vmatprep.subr.bf16.mxu1 %v5750_v22  ;;  %v5843_v22 = vld [vmem:[#allocation7 + $0x64] ss:$16 sps:$4 sm:$0xff]  }
  0xa2   :  { %1159 = vmatpush1.bf16.msra.mxu0 %v5686_v4  ;;  %v6185_v4 = vmov 0.0  }
  0xa3   :  { %1160 = vmatprep.subr.bf16.mxu0 %v5693_v5  ;;  %5437 = vmatpush3.bf16.msra.mxu1 %v5754_v25  ;;  %v5825_v5 = vld [vmem:[#allocation7 + $0x4] ss:$16 sps:$4 sm:$0xff]   ;;  %v5786_v25 = vld [vmem:[#allocation5 + $0x378] ss:$12 sps:$4 sm:$0xff]  }
  0xa4   :  { %5444 = vmatprep.subr.bf16.mxu1 %v5755_v27  ;;  %v5791_v27 = vld [vmem:[#allocation5 + $0x390] ss:$12 sps:$4 sm:$0xff]  }
  0xa6   :  { %1161 = vmatpush1.bf16.msra.mxu0 %v5691_v8  ;;  %1352 = vmatmul.mubr.bf16.vlgmr.msra.gmra.mrb[8].mxu1 %v6310_v29  ;;  %v5761_v8 = vld [vmem:[#allocation5 + $0x300] ss:$12 sps:$4 sm:$0xff]  }
  0xa7   :  { %1162 = vmatprep.subr.bf16.mxu0 %v5698_v9  ;;  %5445 = vmatpush3.bf16.msra.mxu1 %v5759_v30  ;;  %v5768_v9 = vld [vmem:[#allocation5 + $0x31c] ss:$12 sps:$4 sm:$0xff]   ;;  %v5800_v30 = vld [vmem:[#allocation5 + $0x3c4] ss:$12 sps:$4 sm:$0xff]  }
  0xa8   :  { %5446 = vmatprep.subr.bf16.mxu1 %v5760_v32  ;;  %1391 = vmatprep.mubr.bf16.mxu1 %v112_v50  ;;  %v5804_v32 = vld [vmem:[#allocation5 + $0x3dc] ss:$12 sps:$4 sm:$0xff]  }
  0xaa   :  { %1163 = vmatpush1.bf16.msra.mxu0 %v5696_v12  ;;  %v5766_v12 = vld [vmem:[#allocation5 + $0x318] ss:$12 sps:$4 sm:$0xff]  }
  0xab   :  { %1164 = vmatprep.subr.bf16.mxu0 %v5703_v13  ;;  %5447 = vmatpush3.bf16.msra.mxu1 %v5764_v35  ;;  %v5773_v13 = vld [vmem:[#allocation5 + $0x334] ss:$12 sps:$4 sm:$0xff]   ;;  %v5805_v35 = vld [vmem:[#allocation5 + $0x3f0] ss:$12 sps:$4 sm:$0xff]  }
  0xac   :  { %5448 = vmatprep.subr.bf16.mxu1 %v5765_v36  ;;  %v5810_v36 = vld [vmem:[#allocation5 + $0x40c] ss:$12 sps:$4 sm:$0xff]  }
  0xae   :  { %1165 = vmatpush1.bf16.msra.mxu0 %v5701_v18  ;;  %v5835_v18 = vld [vmem:[#allocation7 + $0x40] ss:$16 sps:$4 sm:$0xff]  }
  0xaf   :  { %1166 = vmatprep.subr.bf16.mxu0 %v5708_v19  ;;  %5449 = vmatpush3.bf16.msra.mxu1 %v5769_v39  ;;  %v5776_v19 = vld [vmem:[#allocation5 + $0x348] ss:$12 sps:$4 sm:$0xff]   ;;  %v5811_v39 = vld [vmem:[#allocation5 + $0x420] ss:$12 sps:$4 sm:$0xff]  }
  0xb0   :  { %5450 = vmatprep.subr.bf16.mxu1 %v5770_v40  ;;  %v5847_v40 = vld [vmem:[#allocation7 + $0x80] ss:$16 sps:$4 sm:$0xff]  }
  0xb2   :  { %1167 = vmatpush1.bf16.msra.mxu0 %v5706_v23  ;;  %v5781_v23 = vld [vmem:[#allocation5 + $0x360] ss:$12 sps:$4 sm:$0xff]  }
  0xb3   :  { %1168 = vmatprep.subr.bf16.mxu0 %v5713_v24  ;;  %5451 = vmatpush3.bf16.msra.mxu1 %v5774_v43  ;;  %v5788_v24 = vld [vmem:[#allocation5 + $0x37c] ss:$12 sps:$4 sm:$0xff]   ;;  %v5814_v43 = vld [vmem:[#allocation5 + $0x438] ss:$12 sps:$4 sm:$0xff]  }
  0xb4   :  { %5452 = vmatprep.subr.bf16.mxu1 %v5775_v44  ;;  %v5819_v44 = vld [vmem:[#allocation5 + $0x454] ss:$12 sps:$4 sm:$0xff]  }
  0xb6   :  { %1169 = vmatpush1.bf16.msra.mxu0 %v5711_v28  ;;  %v5797_v28 = vld [vmem:[#allocation5 + $0x3ac] ss:$12 sps:$4 sm:$0xff]  }
  0xb7   :  { %1170 = vmatprep.subr.bf16.mxu0 %v5718_v31  ;;  %5453 = vmatpush3.bf16.msra.mxu1 %v5779_v46  ;;  %v5798_v31 = vld [vmem:[#allocation5 + $0x3c0] ss:$12 sps:$4 sm:$0xff]  }
  0xb8   :  { %5454 = vmatprep.subr.bf16.mxu1 %v5780_v49  ;;  %v5822_v46 = vld [vmem:[#allocation5 + $0x46c] ss:$12 sps:$4 sm:$0xff]   ;;  %v5826_v49 = vld [vmem:[#allocation7 + $0x8] ss:$16 sps:$4 sm:$0xff]  }
  0xba   :  { %1171 = vmatpush1.bf16.msra.mxu0 %v5716_v33  ;;  %v5802_v33 = vld [vmem:[#allocation5 + $0x3d8] ss:$12 sps:$4 sm:$0xff]  }
  0xbb   :  { %1172 = vmatprep.subr.bf16.mxu0 %v5723_v34  ;;  %5455 = vmatpush3.bf16.msra.mxu1 %v5784_v52  ;;  %v5807_v34 = vld [vmem:[#allocation5 + $0x3f4] ss:$12 sps:$4 sm:$0xff]  }
  0xbc   :  { %5456 = vmatprep.subr.bf16.mxu1 %v5785_v54  ;;  %v5840_v52 = vld [vmem:[#allocation7 + $0x4c] ss:$16 sps:$4 sm:$0xff]  }
  0xbd   :  { %v5846_v54 = vld [vmem:[#allocation7 + $0x6c] ss:$16 sps:$4 sm:$0xff]  }
  0xbe   :  { %1173 = vmatpush1.bf16.msra.mxu0 %v5721_v37  ;;  %v5808_v37 = vld [vmem:[#allocation5 + $0x408] ss:$12 sps:$4 sm:$0xff]  }
  0xbf   :  { %1174 = vmatprep.subr.bf16.mxu0 %v5728_v38  ;;  %5457 = vmatpush3.bf16.msra.mxu1 %v5789_v56  ;;  %v5813_v38 = vld [vmem:[#allocation5 + $0x424] ss:$12 sps:$4 sm:$0xff]  }
  0xc0   :  { %5458 = vmatprep.subr.bf16.mxu1 %v5790_v58  ;;  %v5852_v56 = vld [vmem:[#allocation7 + $0x8c] ss:$16 sps:$4 sm:$0xff]   ;;  %v5855_v58 = vld [vmem:[#allocation7 + $0xa4] ss:$16 sps:$4 sm:$0xff]  }
  0xc2   :  { %1175 = vmatpush1.bf16.msra.mxu0 %v5726_v41  ;;  %v5849_v41 = vld [vmem:[#allocation7 + $0x84] ss:$16 sps:$4 sm:$0xff]  }
  0xc3   :  { %1176 = vmatprep.subr.bf16.mxu0 %v5733_v42  ;;  %5459 = vmatpush3.bf16.msra.mxu1 %v5794_v60  ;;  %v5816_v42 = vld [vmem:[#allocation5 + $0x43c] ss:$12 sps:$4 sm:$0xff]   ;;  %v5858_v60 = vld [vmem:[#allocation7 + $0xac] ss:$16 sps:$4 sm:$0xff]  }
  0xc4   :  { %5556 = vmatprep.subr.bf16.mxu1 %v6185_v4 }
  0xc6   :  { %1177 = vmatpush1.bf16.msra.mxu0 %v5731_v45  ;;  %1392 = vmatmul.mubr.bf16.vlgmr.msra.gmra.mrb[12].mxu1 %v6313_v1  ;;  %v5817_v45 = vld [vmem:[#allocation5 + $0x450] ss:$12 sps:$4 sm:$0xff]  }
  0xc7   :  { %1178 = vmatprep.subr.bf16.mxu0 %v5738_v48  ;;  %5557 = vmatpush3.bf16.msra.mxu1 %v5801_v2  ;;  %v5828_v48 = vld [vmem:[#allocation7 + $0xc] ss:$16 sps:$4 sm:$0xff]   ;;  %v5862_v2 = vld [vmem:[#allocation7 + $0xc8] ss:$16 sps:$4 sm:$0xff]  }
  0xc8   :  { %5558 = vmatprep.mubr.msk.bf16.mxu1 %vm6186_vm1, %v6185_v4  ;;  %2043 = vmatprep.subr.bf16.mxu1 %v5825_v5  ;;  %v5867_v4 = vld [vmem:[#allocation7 + $0xe4] ss:$16 sps:$4 sm:$0xff]   ;;  %v5868_v5 = vld [vmem:[#allocation7 + $0xe8] ss:$16 sps:$4 sm:$0xff]  }
  0xca   :  { %1179 = vmatpush1.bf16.msra.mxu0 %v5736_v51  ;;  %v5832_v51 = vld [vmem:[#allocation7 + $0x28] ss:$16 sps:$4 sm:$0xff]  }
  0xcb   :  { %1180 = vmatprep.subr.bf16.mxu0 %v5743_v53  ;;  %v5838_v53 = vld [vmem:[#allocation7 + $0x48] ss:$16 sps:$4 sm:$0xff]  }
  0xce   :  { %1181 = vmatpush1.bf16.msra.mxu0 %v5741_v55  ;;  %5559 = vmatmul.mubr.msk.bf16.vlgmr.msra.gmra.mrb[16].mxu1 %vm1111_vm0, %v6306_v20  ;;  %v5841_v20 = vld [vmem:[#allocation7 + $0x60] ss:$16 sps:$4 sm:$0xff]   ;;  %v5844_v55 = vld [vmem:[#allocation7 + $0x68] ss:$16 sps:$4 sm:$0xff]  }
  0xcf   :  { %1182 = vmatprep.subr.bf16.mxu0 %v5748_v57  ;;  %2044 = vmatpush1.bf16.msra.mxu1 %v5823_v10  ;;  %v5853_v57 = vld [vmem:[#allocation7 + $0xa0] ss:$16 sps:$4 sm:$0xff]   ;;  %v5879_v10 = vld [vmem:[#allocation7 + $0x124] ss:$16 sps:$4 sm:$0xff]  }
  0xd0   :  { %2045 = vmatprep.subr.bf16.mxu1 %v5831_v11  ;;  %v5874_v11 = vld [vmem:[#allocation7 + $0x108] ss:$16 sps:$4 sm:$0xff]  }
  0xd2   :  { %1183 = vmatpush1.bf16.msra.mxu0 %v5746_v59  ;;  %v5850_v59 = vld [vmem:[#allocation7 + $0x88] ss:$16 sps:$4 sm:$0xff]  }
  0xd3   :  { %1184 = vmatprep.subr.bf16.mxu0 %v5753_v62  ;;  %2046 = vmatpush1.bf16.msra.mxu1 %v5829_v14  ;;  %v5861_v62 = vld [vmem:[#allocation7 + $0xc4] ss:$16 sps:$4 sm:$0xff]  }
  0xd4   :  { %2047 = vmatprep.subr.bf16.mxu1 %v5837_v15  ;;  %v5885_v14 = vld [vmem:[#allocation7 + $0x144] ss:$16 sps:$4 sm:$0xff]   ;;  %v5880_v15 = vld [vmem:[#allocation7 + $0x128] ss:$16 sps:$4 sm:$0xff]  }
  0xd6   :  { %1185 = vmatpush1.bf16.msra.mxu0 %v5751_v63  ;;  %v5856_v63 = vld [vmem:[#allocation7 + $0xa8] ss:$16 sps:$4 sm:$0xff]  }
  0xd7   :  { %1186 = vmatprep.subr.bf16.mxu0 %v5758_v3  ;;  %2048 = vmatpush1.bf16.msra.mxu1 %v5835_v18  ;;  %v5865_v3 = vld [vmem:[#allocation7 + $0xe0] ss:$16 sps:$4 sm:$0xff]   ;;  %v5891_v18 = vld [vmem:[#allocation7 + $0x164] ss:$16 sps:$4 sm:$0xff]  }
  0xd8   :  { %2049 = vmatprep.subr.bf16.mxu1 %v5843_v22  ;;  %v5897_v22 = vld [vmem:[#allocation7 + $0x184] ss:$16 sps:$4 sm:$0xff]  }
  0xda   :  { %1187 = vmatpush1.bf16.msra.mxu0 %v5756_v6  ;;  %v5870_v6 = vld [vmem:[#allocation7 + $0xec] ss:$16 sps:$4 sm:$0xff]  }
  0xdb   :  { %1197 = vmatprep.subr.bf16.mxu0 %v5763_v7  ;;  %2050 = vmatpush1.bf16.msra.mxu1 %v5841_v20  ;;  %v5873_v7 = vld [vmem:[#allocation7 + $0x104] ss:$16 sps:$4 sm:$0xff]   ;;  %v5889_v20 = vld [vmem:[#allocation7 + $0x160] ss:$16 sps:$4 sm:$0xff]  }
  0xdc   :  { %2051 = vmatprep.subr.bf16.mxu1 %v5849_v41  ;;  %v5912_v41 = vld [vmem:[#allocation7 + $0x1cc] ss:$16 sps:$4 sm:$0xff]  }
  0xdd   :  { %1189 = vmatmul.mubr.bf16.vlgmr.msra.gmra.mrb[0].mxu0 %v6310_v29  ;;  %v5795_v29 = vld [vmem:[#allocation5 + $0x3a8] ss:$12 sps:$4 sm:$0xff]  }
  0xde   :  { %1198 = vmatpush1.bf16.msra.mxu0 %v5761_v8  ;;  %1229 = vmatprep.mubr.bf16.mxu0 %v112_v50  ;;  %v5834_v50 = vld [vmem:[#allocation7 + $0x2c] ss:$16 sps:$4 sm:$0xff]  }
  0xdf   :  { %1199 = vmatprep.subr.bf16.mxu0 %v5768_v9  ;;  %2052 = vmatpush1.bf16.msra.mxu1 %v5847_v40  ;;  %v5876_v8 = vld [vmem:[#allocation7 + $0x10c] ss:$16 sps:$4 sm:$0xff]   ;;  %v5871_v9 = vld [vmem:[#allocation7 + $0x100] ss:$16 sps:$4 sm:$0xff]   ;;  %v5909_v40 = vld [vmem:[#allocation7 + $0x1c4] ss:$16 sps:$4 sm:$0xff]  }
  0xe0   :  { %2053 = vmatprep.subr.bf16.mxu1 %v5855_v58 }
  0xe2   :  { %1200 = vmatpush1.bf16.msra.mxu0 %v5766_v12  ;;  %v5882_v12 = vld [vmem:[#allocation7 + $0x12c] ss:$16 sps:$4 sm:$0xff]  }
  0xe3   :  { %1201 = vmatprep.subr.bf16.mxu0 %v5773_v13  ;;  %2054 = vmatpush1.bf16.msra.mxu1 %v5853_v57  ;;  %v5877_v13 = vld [vmem:[#allocation7 + $0x120] ss:$16 sps:$4 sm:$0xff]  }
  0xe4   :  { %2055 = vmatprep.subr.bf16.mxu1 %v5861_v62 }
  0xe6   :  { %1202 = vmatpush1.bf16.msra.mxu0 %v5771_v16  ;;  %v5888_v16 = vld [vmem:[#allocation7 + $0x14c] ss:$16 sps:$4 sm:$0xff]  }
  0xe7   :  { %1203 = vmatprep.subr.bf16.mxu0 %v5778_v17  ;;  %2056 = vmatpush1.bf16.msra.mxu1 %v5859_v61  ;;  %v5883_v17 = vld [vmem:[#allocation7 + $0x140] ss:$16 sps:$4 sm:$0xff]  }
  0xe8   :  { %2057 = vmatprep.subr.bf16.mxu1 %v5867_v4 }
  0xea   :  { %1204 = vmatpush1.bf16.msra.mxu0 %v5776_v19  ;;  %v5886_v19 = vld [vmem:[#allocation7 + $0x148] ss:$16 sps:$4 sm:$0xff]  }
  0xeb   :  { %1205 = vmatprep.subr.bf16.mxu0 %v5783_v21  ;;  %2058 = vmatpush1.bf16.msra.mxu1 %v5865_v3  ;;  %v5894_v21 = vld [vmem:[#allocation7 + $0x16c] ss:$16 sps:$4 sm:$0xff]  }
  0xec   :  { %2059 = vmatprep.subr.bf16.mxu1 %v5873_v7 }
  0xee   :  { %1206 = vmatpush1.bf16.msra.mxu0 %v5781_v23  ;;  %v5892_v23 = vld [vmem:[#allocation7 + $0x168] ss:$16 sps:$4 sm:$0xff]  }
  0xef   :  { %1207 = vmatprep.subr.bf16.mxu0 %v5788_v24  ;;  %2060 = vmatpush1.bf16.msra.mxu1 %v5871_v9  ;;  %v5900_v24 = vld [vmem:[#allocation7 + $0x18c] ss:$16 sps:$4 sm:$0xff]  }
  0xf0   :  { %2061 = vmatprep.subr.bf16.mxu1 %v5879_v10 }
  0xf2   :  { %1208 = vmatpush1.bf16.msra.mxu0 %v5786_v25 }
  0xf3   :  { %1209 = vmatprep.subr.bf16.mxu0 %v5793_v26  ;;  %2062 = vmatpush1.bf16.msra.mxu1 %v5877_v13  ;;  %v5895_v26 = vld [vmem:[#allocation7 + $0x180] ss:$16 sps:$4 sm:$0xff]  }
  0xf4   :  { %2063 = vmatprep.subr.bf16.mxu1 %v5885_v14 }
  0xf6   :  { %1210 = vmatpush1.bf16.msra.mxu0 %v5791_v27 }
  0xf7   :  { %1211 = vmatprep.subr.bf16.mxu0 %v5797_v28  ;;  %2064 = vmatpush1.bf16.msra.mxu1 %v5883_v17  ;;  %v5903_v28 = vld [vmem:[#allocation7 + $0x1a4] ss:$16 sps:$4 sm:$0xff]  }
  0xf8   :  { %2065 = vmatprep.subr.bf16.mxu1 %v5891_v18 }
  0xfa   :  { %1212 = vmatpush1.bf16.msra.mxu0 %v5795_v29 }
  0xfb   :  { %1213 = vmatprep.subr.bf16.mxu0 %v5800_v30  ;;  %2066 = vmatpush1.bf16.msra.mxu1 %v5889_v20  ;;  %v5898_v30 = vld [vmem:[#allocation7 + $0x188] ss:$16 sps:$4 sm:$0xff]  }
  0xfc   :  { %2067 = vmatprep.subr.bf16.mxu1 %v5897_v22 }
  0xfe   :  { %1214 = vmatpush1.bf16.msra.mxu0 %v5798_v31 }
  0xff   :  { %1215 = vmatprep.subr.bf16.mxu0 %v5804_v32  ;;  %v5906_v32 = vld [vmem:[#allocation7 + $0x1ac] ss:$16 sps:$4 sm:$0xff]   ;;  %2068 = vmatpush1.bf16.msra.mxu1 %v5895_v26  ;;  %v5919_v26 = vld [vmem:[#allocation7 + $0x200] ss:$16 sps:$4 sm:$0xff]  }
 0x100   :  { %2069 = vmatprep.subr.bf16.mxu1 %v5903_v28  ;;  %v5922_v28 = vld [vmem:[#allocation7 + $0x208] ss:$16 sps:$4 sm:$0xff]  }
 0x102   :  { %1216 = vmatpush1.bf16.msra.mxu0 %v5802_v33  ;;  %v5901_v33 = vld [vmem:[#allocation7 + $0x1a0] ss:$16 sps:$4 sm:$0xff]  }
 0x103   :  { %1217 = vmatprep.subr.bf16.mxu0 %v5807_v34  ;;  %v5904_v34 = vld [vmem:[#allocation7 + $0x1a8] ss:$16 sps:$4 sm:$0xff]   ;;  %2070 = vmatpush1.bf16.msra.mxu1 %v5901_v33 }
 0x104   :  { %2071 = vmatprep.subr.bf16.mxu1 %v5909_v40  ;;  %v5928_v33 = vld [vmem:[#allocation7 + $0x228] ss:$16 sps:$4 sm:$0xff]   ;;  %v5945_v40 = vld [vmem:[#allocation7 + $0x284] ss:$16 sps:$4 sm:$0xff]  }
 0x106   :  { %1218 = vmatpush1.bf16.msra.mxu0 %v5805_v35 }
 0x107   :  { %1219 = vmatprep.subr.bf16.mxu0 %v5810_v36 }
 0x10a   :  { %1220 = vmatpush1.bf16.msra.mxu0 %v5808_v37 }
 0x10b   :  { %1221 = vmatprep.subr.bf16.mxu0 %v5813_v38 }
 0x10e   :  { %1222 = vmatpush1.bf16.msra.mxu0 %v5811_v39 }
 0x10f   :  { %1223 = vmatprep.subr.bf16.mxu0 %v5816_v42  ;;  %v5907_v42 = vld [vmem:[#allocation7 + $0x1c0] ss:$16 sps:$4 sm:$0xff]  }
 0x110   :  { %2072 = vmatpush1.bf16.msra.mxu1 %v5907_v42  ;;  %v5943_v42 = vld [vmem:[#allocation7 + $0x280] ss:$16 sps:$4 sm:$0xff]  }
 0x112   :  { %1224 = vmatpush1.bf16.msra.mxu0 %v5814_v43  ;;  %v5910_v43 = vld [vmem:[#allocation7 + $0x1c8] ss:$16 sps:$4 sm:$0xff]  }
 0x113   :  { %1225 = vmatprep.subr.bf16.mxu0 %v5819_v44  ;;  %v5915_v44 = vld [vmem:[#allocation7 + $0x1e4] ss:$16 sps:$4 sm:$0xff]  }
 0x114   :  { %2073 = vmatprep.subr.bf16.mxu1 %v5915_v44  ;;  %v5954_v44 = vld [vmem:[#allocation7 + $0x2ac] ss:$16 sps:$4 sm:$0xff]  }
 0x116   :  { %1226 = vmatpush1.bf16.msra.mxu0 %v5817_v45  ;;  %v5918_v45 = vld [vmem:[#allocation7 + $0x1ec] ss:$16 sps:$4 sm:$0xff]  }
 0x117   :  { %1227 = vmatprep.subr.bf16.mxu0 %v5822_v46  ;;  %v5913_v46 = vld [vmem:[#allocation7 + $0x1e0] ss:$16 sps:$4 sm:$0xff]  }
 0x118   :  { %2074 = vmatpush1.bf16.msra.mxu1 %v5913_v46  ;;  %v5952_v46 = vld [vmem:[#allocation7 + $0x2a8] ss:$16 sps:$4 sm:$0xff]  }
 0x11a   :  { %1228 = vmatpush1.bf16.msra.mxu0 %v5820_v47  ;;  %v5916_v47 = vld [vmem:[#allocation7 + $0x1e8] ss:$16 sps:$4 sm:$0xff]  }
 0x11b   :  { %2125 = vmatprep.subr.bf16.mxu0 %v5828_v48  ;;  %v312_v48 = vlaneseq }
 0x11d   :  { %1230 = vmatmul.mubr.bf16.vlgmr.msra.gmra.mrb[0].mxu0 %v6313_v1  ;;  %v5864_v1 = vld [vmem:[#allocation7 + $0xcc] ss:$16 sps:$4 sm:$0xff]  }
 0x11e   :  { %2126 = vmatpush1.bf16.msra.mxu0 %v5826_v49  ;;  %v5921_v49 = vld [vmem:[#allocation7 + $0x204] ss:$16 sps:$4 sm:$0xff]  }
 0x11f   :  { %2127 = vmatprep.subr.bf16.mxu0 %v5834_v50  ;;  %v5924_v50 = vld [vmem:[#allocation7 + $0x20c] ss:$16 sps:$4 sm:$0xff]   ;;  %2084 = vmatprep.subr.bf16.mxu1 %v5921_v49  ;;  %v5955_v49 = vld [vmem:[#allocation7 + $0x2c0] ss:$16 sps:$4 sm:$0xff]  }
 0x122   :  { %2128 = vmatpush1.bf16.msra.mxu0 %v5832_v51  ;;  %v6324_v51 = vshrl.u32 %v312_v48, 7  ;;  %v5960_v48 = vld [vmem:[#allocation7 + $0x2cc] ss:$16 sps:$4 sm:$0xff]  }
 0x123   :  { %2129 = vmatprep.subr.bf16.mxu0 %v5840_v52 }
 0x124   :  { %v6327_v52 = vsub.s32 2, %v6324_v51  ;;  %v6336_v10 = vsub.s32 0, %v6324_v51 }
 0x126   :  { %2130 = vmatpush1.bf16.msra.mxu0 %v5838_v53  ;;  %v310_v53 = vld [vmem:[%s6429_s2] sm:$0x7] }
 0x127   :  { %2131 = vmatprep.subr.bf16.mxu0 %v5846_v54  ;;  %v323_v54 = vrot.slane %v310_v53, %v6327_v52 }
 0x12a   :  { %2132 = vmatpush1.bf16.msra.mxu0 %v5844_v55 }
 0x12b   :  { %2133 = vmatprep.subr.bf16.mxu0 %v5852_v56 }
 0x12e   :  { %2134 = vmatpush1.bf16.msra.mxu0 %v5850_v59 }
 0x12f   :  { %2135 = vmatprep.subr.bf16.mxu0 %v5858_v60 }
 0x132   :  { %2136 = vmatpush1.bf16.msra.mxu0 %v5856_v63 }
 0x133   :  { %2137 = vmatprep.subr.bf16.mxu0 %v5864_v1 }
 0x136   :  { %2138 = vmatpush1.bf16.msra.mxu0 %v5862_v2 }
 0x137   :  { %2139 = vmatprep.subr.bf16.mxu0 %v5870_v6 }
 0x139   :  { %v6320_v25 = vpop.f32.mrb[0].mxu1 }
 0x13a   :  { %2140 = vmatpush1.bf16.msra.mxu0 %v5868_v5  ;;  %v6322_v27 = vpop.f32.mrb[1].mxu1 }
 0x13b   :  { %2141 = vmatprep.subr.bf16.mxu0 %v5876_v8  ;;  %v1276_v29 = vpop.f32.mrb[2].mxu1 }
 0x13c   :  { %v1277_v31 = vpop.f32.mrb[3].mxu1 }
 0x13d   :  { %v5930_v31 = vld [vmem:[#allocation7 + $0x22c] ss:$16 sps:$4 sm:$0xff]  }
 0x13e   :  { %2142 = vmatpush1.bf16.msra.mxu0 %v5874_v11  ;;  %v6339_v11 = vsub.s32 1, %v6324_v51 }
 0x13f   :  { %2143 = vmatprep.subr.bf16.mxu0 %v5882_v12  ;;  %v315_v12 = vrot.slane %v310_v53, %v6336_v10 }
 0x140   :  { %v319_v13 = vrot.slane %v310_v53, %v6339_v11  ;;  %v5963_v53 = vld [vmem:[#allocation7 + $0x2e4] ss:$16 sps:$4 sm:$0xff]  }
 0x142   :  { %2144 = vmatpush1.bf16.msra.mxu0 %v5880_v15 }
 0x143   :  { %2145 = vmatprep.subr.bf16.mxu0 %v5888_v16 }
 0x146   :  { %2146 = vmatpush1.bf16.msra.mxu0 %v5886_v19 }
 0x147   :  { %2147 = vmatprep.subr.bf16.mxu0 %v5894_v21 }
 0x14a   :  { %2148 = vmatpush1.bf16.msra.mxu0 %v5892_v23 }
 0x14b   :  { %2149 = vmatprep.subr.bf16.mxu0 %v5900_v24 }
 0x14e   :  { %2150 = vmatpush1.bf16.msra.mxu0 %v5898_v30  ;;  %v5927_v30 = vld [vmem:[#allocation7 + $0x224] ss:$16 sps:$4 sm:$0xff]  }
 0x14f   :  { %2151 = vmatprep.subr.bf16.mxu0 %v5906_v32  ;;  %v5925_v32 = vld [vmem:[#allocation7 + $0x220] ss:$16 sps:$4 sm:$0xff]  }
 0x152   :  { %2152 = vmatpush1.bf16.msra.mxu0 %v5904_v34  ;;  %v5931_v34 = vld [vmem:[#allocation7 + $0x240] ss:$16 sps:$4 sm:$0xff]  }
 0x153   :  { %2153 = vmatprep.subr.bf16.mxu0 %v5912_v41  ;;  %v5948_v41 = vld [vmem:[#allocation7 + $0x28c] ss:$16 sps:$4 sm:$0xff]  }
 0x156   :  { %2154 = vmatpush1.bf16.msra.mxu0 %v5910_v43  ;;  %v5951_v43 = vld [vmem:[#allocation7 + $0x2a4] ss:$16 sps:$4 sm:$0xff]  }
 0x157   :  { %2155 = vmatprep.subr.bf16.mxu0 %v5918_v45  ;;  %v5949_v45 = vld [vmem:[#allocation7 + $0x2a0] ss:$16 sps:$4 sm:$0xff]  }
 0x159   :  { %v5416_v35 = vpop.f32.mrb[4].mxu1 }
 0x15a   :  { %v5417_v36 = vpop.f32.mrb[5].mxu1  ;;  %2156 = vmatpush1.bf16.msra.mxu0 %v5916_v47  ;;  %v5957_v47 = vld [vmem:[#allocation7 + $0x2c4] ss:$16 sps:$4 sm:$0xff]  }
 0x15b   :  { %v5418_v37 = vadd.f32 %v5417_v36, %v5416_v35  ;;  %v5419_v38 = vpop.f32.mrb[6].mxu1  ;;  %2166 = vmatprep.subr.bf16.mxu0 %v5924_v50  ;;  %v5934_v35 = vld [vmem:[#allocation7 + $0x248] ss:$16 sps:$4 sm:$0xff]   ;;  %v5939_v36 = vld [vmem:[#allocation7 + $0x264] ss:$16 sps:$4 sm:$0xff]  }
 0x15c   :  { %v5420_v39 = vpop.f32.mrb[7].mxu1  ;;  %v5937_v38 = vld [vmem:[#allocation7 + $0x260] ss:$16 sps:$4 sm:$0xff]   ;;  %v5958_v50 = vld [vmem:[#allocation7 + $0x2c8] ss:$16 sps:$4 sm:$0xff]  }
 0x15d   :  { %v1314_v55 = vadd.f32 %v5418_v37, %v323_v54  ;;  %v5942_v37 = vld [vmem:[#allocation7 + $0x26c] ss:$16 sps:$4 sm:$0xff]   ;;  %v5940_v39 = vld [vmem:[#allocation7 + $0x268] ss:$16 sps:$4 sm:$0xff]  }
 0x15e   :  { %v5966_v54 = vld [vmem:[#allocation7 + $0x2ec] ss:$16 sps:$4 sm:$0xff]  }
 0x179   :  { %v5438_v56 = vpop.f32.mrb[8].mxu1 }
 0x17a   :  { %v5439_v57 = vpop.f32.mrb[9].mxu1 }
 0x17b   :  { %v5440_v58 = vadd.f32 %v5439_v57, %v5438_v56  ;;  %v5441_v59 = vpop.f32.mrb[10].mxu1  ;;  %v2219_v56 = vld [vmem:[#allocation8 + $0x20] sm:$0xff]  ;;  %v2216_v57 = vld [vmem:[#allocation8 + $0x8] sm:$0xff] }
 0x17c   :  { %v5442_v60 = vpop.f32.mrb[11].mxu1  ;;  %v5961_v59 = vld [vmem:[#allocation7 + $0x2e0] ss:$16 sps:$4 sm:$0xff]  }
 0x17d   :  { %v1354_v61 = vadd.f32 %v5440_v58, %v1314_v55  ;;  %v2215_v55 = vld [vmem:[#allocation8] sm:$0xff]  ;;  %v2220_v58 = vld [vmem:[#allocation8 + $0x28] sm:$0xff] }
 0x17e   :  { %v5964_v60 = vld [vmem:[#allocation7 + $0x2e8] ss:$16 sps:$4 sm:$0xff]  }
 0x199   :  { %v5460_v62 = vpop.f32.mrb[12].mxu1 }
 0x19a   :  { %v5461_v63 = vpop.f32.mrb[13].mxu1 }
 0x19b   :  { %v5462_v1 = vadd.f32 %v5461_v63, %v5460_v62  ;;  %v5463_v2 = vpop.f32.mrb[14].mxu1  ;;  %v5080_v62 = vcombine.high %v2215_v55, %v2219_v56  ;;  %v5082_v63 = vcombine.high %v2216_v57, %v2220_v58 }
 0x19c   :  { %v5464_v3 = vpop.f32.mrb[15].mxu1  ;;  %v2227_v2 = vld [vmem:[#allocation8 + $0x60] sm:$0xff] }
 0x19d   :  { %v1394_v4 = vadd.f32 %v5462_v1, %v1354_v61  ;;  %v2223_v1 = vld [vmem:[#allocation8 + $0x40] sm:$0xff]  ;;  %v2224_v3 = vld [vmem:[#allocation8 + $0x48] sm:$0xff] }
 0x1a1   :  { %v1433_v5 = vpop.f32.mrb[16].mxu1 }
 0x1a2   :  { %v6333_v6 = vadd.f32 %v1433_v5, %v1394_v4  ;;  %v5560_v7 = vpop.f32.mrb[17].mxu1  ;;  %v2228_v4 = vld [vmem:[#allocation8 + $0x68] sm:$0xff]  ;;  %v5079_v5 = vcombine.low %v2215_v55, %v2219_v56 }
 0x1a3   :  { %v1436_v8 = vpop.f32.mrb[18].mxu1  ;;  %v5081_v7 = vcombine.low %v2216_v57, %v2220_v58  ;;  %v2272_v55 = vld [vmem:[#allocation8 + $0x1c8] sm:$0xff] }
 0x1a4   :  { %v5561_v9 = vpop.f32.mrb[19].mxu1  ;;  %v1441_v61 = vmax.f32 %v6333_v6, 0.0  ;;  %v2232_v6 = vld [vmem:[#allocation8 + $0x88] sm:$0xff] }
 0x1a5   :  { %v5088_v9 = vcombine.high %v2223_v1, %v2227_v2  ;;  %v2276_v56 = vld [vmem:[#allocation8 + $0x1e8] sm:$0xff] }
 0x1a6   :  { %v1444_v8 = vpack.c.bf16 %v1441_v61, %v1441_v61  ;;  %v2279_v61 = vld [vmem:[#allocation8 + $0x200] sm:$0xff] }
 0x1f0   :  { %v1231_v14 = vpop.f32.mrb[0].mxu0 }
 0x1f1   :  { %v5562_v15 = vadd.f32 %v1231_v14, %v315_v12  ;;  %v1233_v16 = vpop.f32.mrb[1].mxu0  ;;  %v5090_v12 = vcombine.high %v2224_v3, %v2228_v4  ;;  %v2235_v14 = vld [vmem:[#allocation8 + $0xa0] sm:$0xff] }
 0x1f2   :  { %v5564_v17 = vadd.f32 %v1233_v16, %v319_v13  ;;  %v1235_v18 = vpop.f32.mrb[2].mxu0  ;;  %v2231_v13 = vld [vmem:[#allocation8 + $0x80] sm:$0xff]  ;;  %v5087_v16 = vcombine.low %v2223_v1, %v2227_v2  ;;  %v2284_v1 = vld [vmem:[#allocation8 + $0x228] sm:$0xff] }
 0x1f3   :  { %v5563_v19 = vadd.f32 %v5562_v15, %v6320_v25  ;;  %v1236_v21 = vpop.f32.mrb[3].mxu0  ;;  %v5933_v25 = vld [vmem:[#allocation7 + $0x244] ss:$16 sps:$4 sm:$0xff]   ;;  %v2236_v15 = vld [vmem:[#allocation8 + $0xa8] sm:$0xff]  ;;  %v5096_v18 = vcombine.high %v2231_v13, %v2235_v14 }
 0x1f4   :  { %v5565_v20 = vadd.f32 %v5564_v17, %v6322_v27  ;;  %v5936_v27 = vld [vmem:[#allocation7 + $0x24c] ss:$16 sps:$4 sm:$0xff]   ;;  %v5089_v17 = vcombine.low %v2224_v3, %v2228_v4  ;;  %v2239_v21 = vld [vmem:[#allocation8 + $0xc0] sm:$0xff]  ;;  %v5137_v3 = vcombine.low %v2272_v55, %v2276_v56 }
 0x1f5   :  { %v1439_v22 = vmax.f32 %v5563_v19, 0.0  ;;  %v5098_v19 = vcombine.high %v2232_v6, %v2236_v15 }
 0x1f6   :  { %v1440_v23 = vmax.f32 %v5565_v20, 0.0  ;;  %v2243_v20 = vld [vmem:[#allocation8 + $0xe0] sm:$0xff] }
 0x1f7   :  { %v1442_v29 = vpack.c.bf16 %v1439_v22, %v1439_v22  ;;  %v2240_v22 = vld [vmem:[#allocation8 + $0xc8] sm:$0xff] }
 0x1f8   :  { %v1443_v24 = vpack.c.bf16 %v1440_v23, %v1440_v23  ;;  %v2244_v23 = vld [vmem:[#allocation8 + $0xe8] sm:$0xff] }
 0x1fa   :  { %2075 = vmatprep.mubr.bf16.mxu1 %v1443_v24  ;;  %2157 = vmatprep.mubr.bf16.mxu0 %v1443_v24  ;;  %v5095_v24 = vcombine.low %v2231_v13, %v2235_v14 }
 0x1fb   :  { %2076 = vmatmul.mubr.bf16.vlgmr.msra.gmra.mrb[20].mxu1 %v1442_v29  ;;  %2158 = vmatmul.mubr.bf16.vlgmr.msra.gmra.mrb[4].mxu0 %v1442_v29  ;;  %v5106_v29 = vcombine.high %v2240_v22, %v2244_v23 }
 0x1fc   :  { %2085 = vmatpush1.bf16.msra.mxu1 %v5919_v26  ;;  %2167 = vmatpush1.bf16.msra.mxu0 %v5922_v28  ;;  %v5097_v26 = vcombine.low %v2232_v6, %v2236_v15  ;;  %v5104_v28 = vcombine.high %v2239_v21, %v2243_v20 }
 0x1fd   :  { %2086 = vmatprep.subr.bf16.mxu1 %v5927_v30  ;;  %2168 = vmatprep.subr.bf16.mxu0 %v5930_v31  ;;  %v2247_v30 = vld [vmem:[#allocation8 + $0x100] sm:$0xff] }
 0x1fe   :  { %2116 = vmatprep.mubr.bf16.mxu1 %v6184_v0  ;;  %2198 = vmatprep.mubr.bf16.mxu0 %v6184_v0  ;;  %v5946_v0 = vld [vmem:[#allocation7 + $0x288] ss:$16 sps:$4 sm:$0xff]   ;;  %v2251_v31 = vld [vmem:[#allocation8 + $0x120] sm:$0xff] }
 0x200   :  { %2087 = vmatpush1.bf16.msra.mxu1 %v5925_v32  ;;  %2169 = vmatpush1.bf16.msra.mxu0 %v5928_v33  ;;  %v2248_v32 = vld [vmem:[#allocation8 + $0x108] sm:$0xff] }
 0x201   :  { %2088 = vmatprep.subr.bf16.mxu1 %v5933_v25  ;;  %2170 = vmatprep.subr.bf16.mxu0 %v5936_v27  ;;  %v2252_v33 = vld [vmem:[#allocation8 + $0x128] sm:$0xff]  ;;  %v5103_v25 = vcombine.low %v2239_v21, %v2243_v20  ;;  %v5105_v27 = vcombine.low %v2240_v22, %v2244_v23 }
 0x204   :  { %2089 = vmatpush1.bf16.msra.mxu1 %v5931_v34  ;;  %2171 = vmatpush1.bf16.msra.mxu0 %v5934_v35  ;;  %v5112_v34 = vcombine.high %v2247_v30, %v2251_v31  ;;  %v5114_v35 = vcombine.high %v2248_v32, %v2252_v33 }
 0x205   :  { %2090 = vmatprep.subr.bf16.mxu1 %v5939_v36  ;;  %2172 = vmatprep.subr.bf16.mxu0 %v5942_v37  ;;  %v2255_v36 = vld [vmem:[#allocation8 + $0x140] sm:$0xff] }
 0x206   :  { %v2259_v37 = vld [vmem:[#allocation8 + $0x160] sm:$0xff] }
 0x208   :  { %2091 = vmatpush1.bf16.msra.mxu1 %v5937_v38  ;;  %2173 = vmatpush1.bf16.msra.mxu0 %v5940_v39  ;;  %v2256_v38 = vld [vmem:[#allocation8 + $0x148] sm:$0xff] }
 0x209   :  { %2092 = vmatprep.subr.bf16.mxu1 %v5945_v40  ;;  %2174 = vmatprep.subr.bf16.mxu0 %v5948_v41  ;;  %v2260_v39 = vld [vmem:[#allocation8 + $0x168] sm:$0xff]  ;;  %v5111_v40 = vcombine.low %v2247_v30, %v2251_v31  ;;  %v5113_v41 = vcombine.low %v2248_v32, %v2252_v33 }
 0x20c   :  { %2093 = vmatpush1.bf16.msra.mxu1 %v5943_v42  ;;  %2175 = vmatpush1.bf16.msra.mxu0 %v5946_v0  ;;  %v5120_v42 = vcombine.high %v2255_v36, %v2259_v37  ;;  %v5122_v0 = vcombine.high %v2256_v38, %v2260_v39 }
 0x20d   :  { %2094 = vmatprep.subr.bf16.mxu1 %v5951_v43  ;;  %2176 = vmatprep.subr.bf16.mxu0 %v5954_v44  ;;  %v2263_v43 = vld [vmem:[#allocation8 + $0x180] sm:$0xff] }
 0x20e   :  { %v2267_v44 = vld [vmem:[#allocation8 + $0x1a0] sm:$0xff] }
 0x20f   :  { %v5127_v57 = vcombine.low %v2263_v43, %v2267_v44 }
 0x210   :  { %2095 = vmatpush1.bf16.msra.mxu1 %v5949_v45  ;;  %2177 = vmatpush1.bf16.msra.mxu0 %v5952_v46  ;;  %v2264_v45 = vld [vmem:[#allocation8 + $0x188] sm:$0xff] }
 0x211   :  { %2096 = vmatprep.subr.bf16.mxu1 %v5957_v47  ;;  %2178 = vmatprep.subr.bf16.mxu0 %v5960_v48  ;;  %v2268_v46 = vld [vmem:[#allocation8 + $0x1a8] sm:$0xff]  ;;  %v5119_v47 = vcombine.low %v2255_v36, %v2259_v37  ;;  %v5121_v48 = vcombine.low %v2256_v38, %v2260_v39 }
 0x212   :  { %v5129_v58 = vcombine.low %v2264_v45, %v2268_v46 }
 0x214   :  { %2097 = vmatpush1.bf16.msra.mxu1 %v5955_v49  ;;  %2179 = vmatpush1.bf16.msra.mxu0 %v5958_v50  ;;  %v5128_v49 = vcombine.high %v2263_v43, %v2267_v44  ;;  %v5130_v50 = vcombine.high %v2264_v45, %v2268_v46 }
 0x215   :  { %2098 = vmatprep.subr.bf16.mxu1 %v5963_v53  ;;  %2180 = vmatprep.subr.bf16.mxu0 %v5966_v54  ;;  %v2271_v53 = vld [vmem:[#allocation8 + $0x1c0] sm:$0xff] }
 0x216   :  { %v2275_v54 = vld [vmem:[#allocation8 + $0x1e0] sm:$0xff] }
 0x217   :  { %v5135_v2 = vcombine.low %v2271_v53, %v2275_v54 }
 0x218   :  { %2099 = vmatpush1.bf16.msra.mxu1 %v5961_v59  ;;  %2181 = vmatpush1.bf16.msra.mxu0 %v5964_v60  ;;  %v5136_v59 = vcombine.high %v2271_v53, %v2275_v54  ;;  %v5138_v60 = vcombine.high %v2272_v55, %v2276_v56  ;;  %v2328_v53 = vld [vmem:[#allocation8 + $0x388] sm:$0xff] }
 0x219   :  { %3793 = vmatprep.subr.bf16.mxu1 %v5080_v62  ;;  %3875 = vmatprep.subr.bf16.mxu0 %v5082_v63  ;;  %v2283_v62 = vld [vmem:[#allocation8 + $0x220] sm:$0xff]  ;;  %v2280_v63 = vld [vmem:[#allocation8 + $0x208] sm:$0xff] }
 0x21a   :  { %v5144_v4 = vcombine.high %v2279_v61, %v2283_v62  ;;  %v5143_v13 = vcombine.low %v2279_v61, %v2283_v62  ;;  %v5145_v14 = vcombine.low %v2280_v63, %v2284_v1  ;;  %v2332_v55 = vld [vmem:[#allocation8 + $0x3a8] sm:$0xff] }
 0x21b   :  { %2117 = vmatmul.mubr.bf16.vlgmr.msra.gmra.mrb[20].mxu1 %v1444_v8  ;;  %2199 = vmatmul.mubr.bf16.vlgmr.msra.gmra.mrb[4].mxu0 %v1444_v8  ;;  %v2291_v8 = vld [vmem:[#allocation8 + $0x260] sm:$0xff]  ;;  %v2336_v61 = vld [vmem:[#allocation8 + $0x3c8] sm:$0xff] }
 0x21c   :  { %3794 = vmatpush1.bf16.msra.mxu1 %v5079_v5  ;;  %3876 = vmatpush1.bf16.msra.mxu0 %v5081_v7  ;;  %v5146_v5 = vcombine.high %v2280_v63, %v2284_v1  ;;  %v2287_v7 = vld [vmem:[#allocation8 + $0x240] sm:$0xff]  ;;  %v2340_v63 = vld [vmem:[#allocation8 + $0x3e8] sm:$0xff] }
 0x21d   :  { %3795 = vmatprep.subr.bf16.mxu1 %v5088_v9  ;;  %3877 = vmatprep.subr.bf16.mxu0 %v5090_v12  ;;  %v2288_v9 = vld [vmem:[#allocation8 + $0x248] sm:$0xff]  ;;  %v5152_v6 = vcombine.high %v2287_v7, %v2291_v8  ;;  %v5151_v21 = vcombine.low %v2287_v7, %v2291_v8 }
 0x21e   :  { %v2292_v12 = vld [vmem:[#allocation8 + $0x268] sm:$0xff] }
 0x21f   :  { %v5154_v15 = vcombine.high %v2288_v9, %v2292_v12  ;;  %v5153_v20 = vcombine.low %v2288_v9, %v2292_v12  ;;  %v2344_v7 = vld [vmem:[#allocation8 + $0x408] sm:$0xff] }
 0x220   :  { %3796 = vmatpush1.bf16.msra.mxu1 %v5087_v16  ;;  %3878 = vmatpush1.bf16.msra.mxu0 %v5089_v17  ;;  %v2295_v16 = vld [vmem:[#allocation8 + $0x280] sm:$0xff]  ;;  %v2348_v9 = vld [vmem:[#allocation8 + $0x428] sm:$0xff] }
 0x221   :  { %3797 = vmatprep.subr.bf16.mxu1 %v5096_v18  ;;  %3879 = vmatprep.subr.bf16.mxu0 %v5098_v19  ;;  %v2299_v17 = vld [vmem:[#allocation8 + $0x2a0] sm:$0xff]  ;;  %v2296_v18 = vld [vmem:[#allocation8 + $0x288] sm:$0xff] }
 0x222   :  { %v2300_v19 = vld [vmem:[#allocation8 + $0x2a8] sm:$0xff]  ;;  %v5160_v22 = vcombine.high %v2295_v16, %v2299_v17  ;;  %v5159_v30 = vcombine.low %v2295_v16, %v2299_v17 }
 0x223   :  { %v5162_v23 = vcombine.high %v2296_v18, %v2300_v19  ;;  %v5161_v31 = vcombine.low %v2296_v18, %v2300_v19 }
 0x224   :  { %3798 = vmatpush1.bf16.msra.mxu1 %v5095_v24  ;;  %3880 = vmatpush1.bf16.msra.mxu0 %v5097_v26  ;;  %v2303_v24 = vld [vmem:[#allocation8 + $0x2c0] sm:$0xff] }
 0x225   :  { %3799 = vmatprep.subr.bf16.mxu1 %v5104_v28  ;;  %3881 = vmatprep.subr.bf16.mxu0 %v5106_v29  ;;  %v2307_v26 = vld [vmem:[#allocation8 + $0x2e0] sm:$0xff]  ;;  %v2304_v28 = vld [vmem:[#allocation8 + $0x2c8] sm:$0xff] }
 0x226   :  { %v2308_v29 = vld [vmem:[#allocation8 + $0x2e8] sm:$0xff]  ;;  %v5168_v32 = vcombine.high %v2303_v24, %v2307_v26  ;;  %v5167_v36 = vcombine.low %v2303_v24, %v2307_v26 }
 0x227   :  { %v5170_v33 = vcombine.high %v2304_v28, %v2308_v29  ;;  %v5169_v37 = vcombine.low %v2304_v28, %v2308_v29 }
 0x228   :  { %3800 = vmatpush1.bf16.msra.mxu1 %v5103_v25  ;;  %3882 = vmatpush1.bf16.msra.mxu0 %v5105_v27  ;;  %v2311_v25 = vld [vmem:[#allocation8 + $0x300] sm:$0xff] }
 0x229   :  { %3801 = vmatprep.subr.bf16.mxu1 %v5112_v34  ;;  %3883 = vmatprep.subr.bf16.mxu0 %v5114_v35  ;;  %v2315_v27 = vld [vmem:[#allocation8 + $0x320] sm:$0xff]  ;;  %v2312_v34 = vld [vmem:[#allocation8 + $0x308] sm:$0xff] }
 0x22a   :  { %v2316_v35 = vld [vmem:[#allocation8 + $0x328] sm:$0xff]  ;;  %v5176_v38 = vcombine.high %v2311_v25, %v2315_v27  ;;  %v5175_v43 = vcombine.low %v2311_v25, %v2315_v27  ;;  %v2351_v25 = vld [vmem:[#allocation8 + $0x440] sm:$0xff] }
 0x22b   :  { %v5178_v39 = vcombine.high %v2312_v34, %v2316_v35  ;;  %v5177_v44 = vcombine.low %v2312_v34, %v2316_v35  ;;  %v2355_v34 = vld [vmem:[#allocation8 + $0x460] sm:$0xff]  ;;  %v2352_v35 = vld [vmem:[#allocation8 + $0x448] sm:$0xff] }
 0x22c   :  { %3802 = vmatpush1.bf16.msra.mxu1 %v5111_v40  ;;  %3884 = vmatpush1.bf16.msra.mxu0 %v5113_v41  ;;  %v2319_v40 = vld [vmem:[#allocation8 + $0x340] sm:$0xff] }
 0x22d   :  { %3803 = vmatprep.subr.bf16.mxu1 %v5120_v42  ;;  %3885 = vmatprep.subr.bf16.mxu0 %v5122_v0  ;;  %v2323_v41 = vld [vmem:[#allocation8 + $0x360] sm:$0xff]  ;;  %v2320_v42 = vld [vmem:[#allocation8 + $0x348] sm:$0xff] }
 0x22e   :  { %v2324_v0 = vld [vmem:[#allocation8 + $0x368] sm:$0xff]  ;;  %v5184_v45 = vcombine.high %v2319_v40, %v2323_v41 }
 0x22f   :  { %v5186_v46 = vcombine.high %v2320_v42, %v2324_v0 }
 0x230   :  { %3804 = vmatpush1.bf16.msra.mxu1 %v5119_v47  ;;  %3886 = vmatpush1.bf16.msra.mxu0 %v5121_v48  ;;  %v5183_v47 = vcombine.low %v2319_v40, %v2323_v41  ;;  %v5185_v48 = vcombine.low %v2320_v42, %v2324_v0  ;;  %v5216_v40 = vcombine.high %v2351_v25, %v2355_v34  ;;  %v2363_v42 = vld [vmem:[#allocation8 + $0x4a0] sm:$0xff]  ;;  %v2360_v0 = vld [vmem:[#allocation8 + $0x488] sm:$0xff] }
 0x231   :  { %3805 = vmatprep.subr.bf16.mxu1 %v5128_v49  ;;  %3887 = vmatprep.subr.bf16.mxu0 %v5130_v50  ;;  %v2327_v49 = vld [vmem:[#allocation8 + $0x380] sm:$0xff] }
 0x232   :  { %v2331_v50 = vld [vmem:[#allocation8 + $0x3a0] sm:$0xff] }
 0x233   :  { %v5192_v54 = vcombine.high %v2327_v49, %v2331_v50  ;;  %v5191_v56 = vcombine.low %v2327_v49, %v2331_v50  ;;  %v2367_v49 = vld [vmem:[#allocation8 + $0x4c0] sm:$0xff] }
 0x234   :  { %3806 = vmatpush1.bf16.msra.mxu1 %v5127_v57  ;;  %3888 = vmatpush1.bf16.msra.mxu0 %v5129_v58  ;;  %v5193_v57 = vcombine.low %v2328_v53, %v2332_v55  ;;  %v5194_v58 = vcombine.high %v2328_v53, %v2332_v55  ;;  %v2371_v50 = vld [vmem:[#allocation8 + $0x4e0] sm:$0xff]  ;;  %v2368_v53 = vld [vmem:[#allocation8 + $0x4c8] sm:$0xff] }
 0x235   :  { %3807 = vmatprep.subr.bf16.mxu1 %v5136_v59  ;;  %3889 = vmatprep.subr.bf16.mxu0 %v5138_v60  ;;  %v2335_v59 = vld [vmem:[#allocation8 + $0x3c0] sm:$0xff] }
 0x236   :  { %v2339_v60 = vld [vmem:[#allocation8 + $0x3e0] sm:$0xff] }
 0x237   :  { %v5200_v62 = vcombine.high %v2335_v59, %v2339_v60  ;;  %v5199_v1 = vcombine.low %v2335_v59, %v2339_v60  ;;  %v2375_v59 = vld [vmem:[#allocation8 + $0x500] sm:$0xff] }
 0x238   :  { %3808 = vmatpush1.bf16.msra.mxu1 %v5135_v2  ;;  %3890 = vmatpush1.bf16.msra.mxu0 %v5137_v3  ;;  %v5201_v2 = vcombine.low %v2336_v61, %v2340_v63  ;;  %v5202_v3 = vcombine.high %v2336_v61, %v2340_v63  ;;  %v2379_v60 = vld [vmem:[#allocation8 + $0x520] sm:$0xff]  ;;  %v2376_v61 = vld [vmem:[#allocation8 + $0x508] sm:$0xff]  ;;  %v5231_v63 = vcombine.low %v2367_v49, %v2371_v50 }
 0x239   :  { %3809 = vmatprep.subr.bf16.mxu1 %v5144_v4  ;;  %3891 = vmatprep.subr.bf16.mxu0 %v5146_v5  ;;  %v2343_v4 = vld [vmem:[#allocation8 + $0x400] sm:$0xff] }
 0x23a   :  { %v2347_v5 = vld [vmem:[#allocation8 + $0x420] sm:$0xff] }
 0x23b   :  { %v5208_v8 = vcombine.high %v2343_v4, %v2347_v5  ;;  %v5207_v12 = vcombine.low %v2343_v4, %v2347_v5  ;;  %v2383_v4 = vld [vmem:[#allocation8 + $0x540] sm:$0xff] }
 0x23c   :  { %3810 = vmatpush1.bf16.msra.mxu1 %v5143_v13  ;;  %3892 = vmatpush1.bf16.msra.mxu0 %v5145_v14  ;;  %v5209_v13 = vcombine.low %v2344_v7, %v2348_v9  ;;  %v5210_v14 = vcombine.high %v2344_v7, %v2348_v9  ;;  %v2387_v5 = vld [vmem:[#allocation8 + $0x560] sm:$0xff]  ;;  %v2384_v7 = vld [vmem:[#allocation8 + $0x548] sm:$0xff]  ;;  %v5239_v9 = vcombine.low %v2375_v59, %v2379_v60 }
 0x23d   :  { %3811 = vmatprep.subr.bf16.mxu1 %v5152_v6  ;;  %3893 = vmatprep.subr.bf16.mxu0 %v5154_v15  ;;  %v6351_v6 = vld [vmem:[%s6431_s4] sm:$0xf]  ;;  %v1557_v15 = vsub.s32 3, %v6324_v51 }
 0x23e   :  { %v1546_v16 = vrot.slane %v6351_v6, %v6336_v10  ;;  %v1550_v17 = vrot.slane %v6351_v6, %v6339_v11 }
 0x23f   :  { %v1558_v18 = vrot.slane %v6351_v6, %v1557_v15 }
 0x240   :  { %3812 = vmatpush1.bf16.msra.mxu1 %v5151_v21  ;;  %3894 = vmatpush1.bf16.msra.mxu0 %v5153_v20 }
 0x241   :  { %3813 = vmatprep.subr.bf16.mxu1 %v5160_v22  ;;  %3895 = vmatprep.subr.bf16.mxu0 %v5162_v23 }
 0x244   :  { %3814 = vmatpush1.bf16.msra.mxu1 %v5159_v30  ;;  %3896 = vmatpush1.bf16.msra.mxu0 %v5161_v31 }
 0x245   :  { %3815 = vmatprep.subr.bf16.mxu1 %v5168_v32  ;;  %3897 = vmatprep.subr.bf16.mxu0 %v5170_v33 }
 0x248   :  { %3816 = vmatpush1.bf16.msra.mxu1 %v5167_v36  ;;  %3898 = vmatpush1.bf16.msra.mxu0 %v5169_v37  ;;  %v2356_v36 = vld [vmem:[#allocation8 + $0x468] sm:$0xff] }
 0x249   :  { %3817 = vmatprep.subr.bf16.mxu1 %v5176_v38  ;;  %3899 = vmatprep.subr.bf16.mxu0 %v5178_v39  ;;  %v2359_v39 = vld [vmem:[#allocation8 + $0x480] sm:$0xff]  ;;  %v5218_v41 = vcombine.high %v2352_v35, %v2356_v36 }
 0x24a   :  { %v5223_v55 = vcombine.low %v2359_v39, %v2363_v42 }
 0x24c   :  { %3818 = vmatpush1.bf16.msra.mxu1 %v5175_v43  ;;  %3900 = vmatpush1.bf16.msra.mxu0 %v5177_v44  ;;  %v2364_v43 = vld [vmem:[#allocation8 + $0x4a8] sm:$0xff] }
 0x24d   :  { %3819 = vmatprep.subr.bf16.mxu1 %v5184_v45  ;;  %3901 = vmatprep.subr.bf16.mxu0 %v5186_v46  ;;  %v5215_v45 = vcombine.low %v2351_v25, %v2355_v34  ;;  %v5217_v46 = vcombine.low %v2352_v35, %v2356_v36  ;;  %v2411_v34 = vld [vmem:[#allocation8 + $0x620] sm:$0xff]  ;;  %v2408_v35 = vld [vmem:[#allocation8 + $0x608] sm:$0xff] }
 0x24e   :  { %v2412_v36 = vld [vmem:[#allocation8 + $0x628] sm:$0xff] }
 0x250   :  { %3820 = vmatpush1.bf16.msra.mxu1 %v5183_v47  ;;  %3902 = vmatpush1.bf16.msra.mxu0 %v5185_v48  ;;  %v5224_v47 = vcombine.high %v2359_v39, %v2363_v42  ;;  %v5226_v48 = vcombine.high %v2360_v0, %v2364_v43  ;;  %v5274_v42 = vcombine.high %v2408_v35, %v2412_v36 }
 0x251   :  { %3821 = vmatprep.subr.bf16.mxu1 %v5192_v54  ;;  %3903 = vmatprep.subr.bf16.mxu0 %v5194_v58  ;;  %v2372_v54 = vld [vmem:[#allocation8 + $0x4e8] sm:$0xff] }
 0x252   :  { %v5234_v58 = vcombine.high %v2368_v53, %v2372_v54 }
 0x254   :  { %3822 = vmatpush1.bf16.msra.mxu1 %v5191_v56  ;;  %3904 = vmatpush1.bf16.msra.mxu0 %v5193_v57  ;;  %v5225_v56 = vcombine.low %v2360_v0, %v2364_v43  ;;  %v5232_v57 = vcombine.high %v2367_v49, %v2371_v50  ;;  %v2415_v0 = vld [vmem:[#allocation8 + $0x640] sm:$0xff] }
 0x255   :  { %3823 = vmatprep.subr.bf16.mxu1 %v5200_v62  ;;  %3905 = vmatprep.subr.bf16.mxu0 %v5202_v3  ;;  %v2380_v62 = vld [vmem:[#allocation8 + $0x528] sm:$0xff]  ;;  %v2419_v43 = vld [vmem:[#allocation8 + $0x660] sm:$0xff] }
 0x256   :  { %v5242_v3 = vcombine.high %v2376_v61, %v2380_v62  ;;  %v5280_v49 = vcombine.high %v2415_v0, %v2419_v43 }
 0x258   :  { %3824 = vmatpush1.bf16.msra.mxu1 %v5199_v1  ;;  %3906 = vmatpush1.bf16.msra.mxu0 %v5201_v2  ;;  %v5233_v1 = vcombine.low %v2368_v53, %v2372_v54  ;;  %v5240_v2 = vcombine.high %v2375_v59, %v2379_v60  ;;  %v2423_v53 = vld [vmem:[#allocation8 + $0x680] sm:$0xff] }
 0x259   :  { %3834 = vmatprep.subr.bf16.mxu1 %v5208_v8  ;;  %3916 = vmatprep.subr.bf16.mxu0 %v5210_v14  ;;  %v2388_v8 = vld [vmem:[#allocation8 + $0x568] sm:$0xff]  ;;  %v2427_v54 = vld [vmem:[#allocation8 + $0x6a0] sm:$0xff] }
 0x25a   :  { %v5250_v14 = vcombine.high %v2384_v7, %v2388_v8  ;;  %v5288_v59 = vcombine.high %v2423_v53, %v2427_v54 }
 0x2ee   :  { %v2118_v19 = vpop.f32.mrb[20].mxu1  ;;  %v6361_v21 = vpop.f32.mrb[4].mxu0 }
 0x2ef   :  { %v5566_v20 = vadd.f32 %v2118_v19, %v1546_v16  ;;  %v2120_v22 = vpop.f32.mrb[21].mxu1  ;;  %v2202_v23 = vpop.f32.mrb[5].mxu0  ;;  %v2391_v16 = vld [vmem:[#allocation8 + $0x580] sm:$0xff]  ;;  %v2396_v19 = vld [vmem:[#allocation8 + $0x5a8] sm:$0xff] }
 0x2f0   :  { %v5567_v24 = vadd.f32 %v2120_v22, %v1550_v17  ;;  %v5569_v26 = vadd.f32 %v2202_v23, %v1558_v18  ;;  %v2122_v28 = vpop.f32.mrb[22].mxu1  ;;  %v2204_v29 = vpop.f32.mrb[6].mxu0  ;;  %v2395_v17 = vld [vmem:[#allocation8 + $0x5a0] sm:$0xff]  ;;  %v2392_v18 = vld [vmem:[#allocation8 + $0x588] sm:$0xff]  ;;  %v5249_v22 = vcombine.low %v2384_v7, %v2388_v8 }
 0x2f1   :  { %v2207_v30 = vmax.f32 %v5566_v20, 0.0  ;;  %v2123_v31 = vpop.f32.mrb[23].mxu1  ;;  %v2205_v32 = vpop.f32.mrb[7].mxu0  ;;  %v5247_v20 = vcombine.low %v2383_v4, %v2387_v5  ;;  %v5256_v23 = vcombine.high %v2391_v16, %v2395_v17  ;;  %v2403_v28 = vld [vmem:[#allocation8 + $0x5e0] sm:$0xff]  ;;  %v2400_v29 = vld [vmem:[#allocation8 + $0x5c8] sm:$0xff] }
 0x2f2   :  { %v2208_v33 = vmax.f32 %v5567_v24, 0.0  ;;  %v2210_v27 = vmax.f32 %v5569_v26, 0.0  ;;  %v5258_v24 = vcombine.high %v2392_v18, %v2396_v19  ;;  %v2399_v26 = vld [vmem:[#allocation8 + $0x5c0] sm:$0xff]  ;;  %v5255_v31 = vcombine.low %v2391_v16, %v2395_v17 }
 0x2f3   :  { %v6365_v38 = vpack.c.bf16 %v2207_v30, %v2207_v30  ;;  %v2404_v30 = vld [vmem:[#allocation8 + $0x5e8] sm:$0xff]  ;;  %v5257_v32 = vcombine.low %v2392_v18, %v2396_v19  ;;  %v5263_v39 = vcombine.low %v2399_v26, %v2403_v28  ;;  %v2439_v7 = vld [vmem:[#allocation8 + $0x700] sm:$0xff] }
 0x2f4   :  { %v6363_v37 = vpack.c.bf16 %v2208_v33, %v2208_v33  ;;  %v6369_v44 = vpack.c.bf16 %v2210_v27, %v2210_v27  ;;  %v5264_v33 = vcombine.high %v2399_v26, %v2403_v28  ;;  %v5266_v25 = vcombine.high %v2400_v29, %v2404_v30  ;;  %v2407_v27 = vld [vmem:[#allocation8 + $0x600] sm:$0xff] }
 0x2f5   :  { %v2443_v8 = vld [vmem:[#allocation8 + $0x720] sm:$0xff] }
 0x2f6   :  { %3825 = vmatprep.mubr.bf16.mxu1 %v6363_v37  ;;  %3907 = vmatprep.mubr.bf16.mxu0 %v6363_v37  ;;  %v5304_v16 = vcombine.high %v2439_v7, %v2443_v8  ;;  %v2447_v18 = vld [vmem:[#allocation8 + $0x740] sm:$0xff] }
 0x2f7   :  { %3826 = vmatmul.mubr.bf16.vlgmr.msra.gmra.mrb[24].mxu1 %v6365_v38  ;;  %3908 = vmatmul.mubr.bf16.vlgmr.msra.gmra.mrb[8].mxu0 %v6365_v38  ;;  %v2451_v19 = vld [vmem:[#allocation8 + $0x760] sm:$0xff] }
 0x2f8   :  { %3835 = vmatpush1.bf16.msra.mxu1 %v5207_v12  ;;  %3917 = vmatpush1.bf16.msra.mxu0 %v5209_v13  ;;  %v5241_v12 = vcombine.low %v2376_v61, %v2380_v62  ;;  %v5248_v13 = vcombine.high %v2383_v4, %v2387_v5  ;;  %v2431_v61 = vld [vmem:[#allocation8 + $0x6c0] sm:$0xff]  ;;  %v5312_v26 = vcombine.high %v2447_v18, %v2451_v19 }
 0x2f9   :  { %3866 = vmatprep.mubr.bf16.mxu1 %v6369_v44  ;;  %3948 = vmatprep.mubr.bf16.mxu0 %v6369_v44  ;;  %v2435_v62 = vld [vmem:[#allocation8 + $0x6e0] sm:$0xff] }
 0x2fa   :  { %3836 = vmatprep.subr.bf16.mxu1 %v5216_v40  ;;  %3918 = vmatprep.subr.bf16.mxu0 %v5218_v41  ;;  %v5265_v40 = vcombine.low %v2400_v29, %v2404_v30  ;;  %v5272_v41 = vcombine.high %v2407_v27, %v2411_v34  ;;  %v5296_v4 = vcombine.high %v2431_v61, %v2435_v62  ;;  %v2455_v29 = vld [vmem:[#allocation8 + $0x780] sm:$0xff] }
 0x2fb   :  { %v2459_v30 = vld [vmem:[#allocation8 + $0x7a0] sm:$0xff] }
 0x2fc   :  { %3837 = vmatpush1.bf16.msra.mxu1 %v5215_v45  ;;  %3919 = vmatpush1.bf16.msra.mxu0 %v5217_v46  ;;  %v2416_v45 = vld [vmem:[#allocation8 + $0x648] sm:$0xff] }
 0x2fd   :  { %3838 = vmatprep.subr.bf16.mxu1 %v5224_v47  ;;  %3920 = vmatprep.subr.bf16.mxu0 %v5226_v48  ;;  %v2420_v46 = vld [vmem:[#allocation8 + $0x668] sm:$0xff]  ;;  %v5271_v47 = vcombine.low %v2407_v27, %v2411_v34  ;;  %v5273_v48 = vcombine.low %v2408_v35, %v2412_v36  ;;  %v1554_v27 = vrot.slane %v6351_v6, %v6327_v52  ;;  %v2463_v36 = vld [vmem:[#allocation8 + $0x7c0] sm:$0xff]  ;;  %v2221_v6 = vld [vmem:[#allocation8 + $0x30] sm:$0xff] }
 0x2fe   :  { %v5282_v50 = vcombine.high %v2416_v45, %v2420_v46  ;;  %v5320_v34 = vcombine.high %v2455_v29, %v2459_v30 }
 0x300   :  { %3839 = vmatpush1.bf16.msra.mxu1 %v5223_v55  ;;  %3921 = vmatpush1.bf16.msra.mxu0 %v5225_v56  ;;  %v2424_v55 = vld [vmem:[#allocation8 + $0x688] sm:$0xff] }
 0x301   :  { %3840 = vmatprep.subr.bf16.mxu1 %v5232_v57  ;;  %3922 = vmatprep.subr.bf16.mxu0 %v5234_v58  ;;  %v2428_v56 = vld [vmem:[#allocation8 + $0x6a8] sm:$0xff]  ;;  %v5279_v57 = vcombine.low %v2415_v0, %v2419_v43  ;;  %v5281_v58 = vcombine.low %v2416_v45, %v2420_v46  ;;  %v5568_v43 = vadd.f32 %v6361_v21, %v1554_v27  ;;  %v2226_v21 = vld [vmem:[#allocation8 + $0x58] sm:$0xff] }
 0x302   :  { %v5290_v60 = vcombine.high %v2424_v55, %v2428_v56  ;;  %v2262_v27 = vld [vmem:[#allocation8 + $0x178] sm:$0xff] }
 0x304   :  { %3841 = vmatpush1.bf16.msra.mxu1 %v5231_v63  ;;  %3923 = vmatpush1.bf16.msra.mxu0 %v5233_v1  ;;  %v2432_v63 = vld [vmem:[#allocation8 + $0x6c8] sm:$0xff] }
 0x305   :  { %3842 = vmatprep.subr.bf16.mxu1 %v5240_v2  ;;  %3924 = vmatprep.subr.bf16.mxu0 %v5242_v3  ;;  %v2436_v1 = vld [vmem:[#allocation8 + $0x6e8] sm:$0xff]  ;;  %v5287_v2 = vcombine.low %v2423_v53, %v2427_v54  ;;  %v5289_v3 = vcombine.low %v2424_v55, %v2428_v56  ;;  %v2209_v54 = vmax.f32 %v5568_v43, 0.0 }
 0x306   :  { %v5298_v5 = vcombine.high %v2432_v63, %v2436_v1 }
 0x308   :  { %3843 = vmatpush1.bf16.msra.mxu1 %v5239_v9  ;;  %3925 = vmatpush1.bf16.msra.mxu0 %v5241_v12  ;;  %v2440_v9 = vld [vmem:[#allocation8 + $0x708] sm:$0xff] }
 0x309   :  { %3844 = vmatprep.subr.bf16.mxu1 %v5248_v13  ;;  %3926 = vmatprep.subr.bf16.mxu0 %v5250_v14  ;;  %v2444_v12 = vld [vmem:[#allocation8 + $0x728] sm:$0xff]  ;;  %v5295_v13 = vcombine.low %v2431_v61, %v2435_v62  ;;  %v5297_v14 = vcombine.low %v2432_v63, %v2436_v1  ;;  %v6378_v61 = vpack.c.bf16 %v2209_v54, %v2209_v54 }
 0x30a   :  { %v5306_v17 = vcombine.high %v2440_v9, %v2444_v12 }
 0x30c   :  { %3845 = vmatpush1.bf16.msra.mxu1 %v5247_v20  ;;  %3927 = vmatpush1.bf16.msra.mxu0 %v5249_v22  ;;  %v2448_v20 = vld [vmem:[#allocation8 + $0x748] sm:$0xff] }
 0x30d   :  { %3846 = vmatprep.subr.bf16.mxu1 %v5256_v23  ;;  %3928 = vmatprep.subr.bf16.mxu0 %v5258_v24  ;;  %v2452_v22 = vld [vmem:[#allocation8 + $0x768] sm:$0xff]  ;;  %v5303_v23 = vcombine.low %v2439_v7, %v2443_v8  ;;  %v5305_v24 = vcombine.low %v2440_v9, %v2444_v12 }
 0x30e   :  { %v5314_v28 = vcombine.high %v2448_v20, %v2452_v22 }
 0x310   :  { %3847 = vmatpush1.bf16.msra.mxu1 %v5255_v31  ;;  %3929 = vmatpush1.bf16.msra.mxu0 %v5257_v32  ;;  %v2456_v31 = vld [vmem:[#allocation8 + $0x788] sm:$0xff] }
 0x311   :  { %3848 = vmatprep.subr.bf16.mxu1 %v5264_v33  ;;  %3930 = vmatprep.subr.bf16.mxu0 %v5266_v25  ;;  %v2460_v32 = vld [vmem:[#allocation8 + $0x7a8] sm:$0xff]  ;;  %v5311_v33 = vcombine.low %v2447_v18, %v2451_v19  ;;  %v5313_v25 = vcombine.low %v2448_v20, %v2452_v22 }
 0x312   :  { %v5322_v35 = vcombine.high %v2456_v31, %v2460_v32  ;;  %v5321_v0 = vcombine.low %v2456_v31, %v2460_v32  ;;  %v2257_v32 = vld [vmem:[#allocation8 + $0x150] sm:$0xff] }
 0x314   :  { %3849 = vmatpush1.bf16.msra.mxu1 %v5263_v39  ;;  %3931 = vmatpush1.bf16.msra.mxu0 %v5265_v40  ;;  %v2467_v39 = vld [vmem:[#allocation8 + $0x7e0] sm:$0xff]  ;;  %v2464_v40 = vld [vmem:[#allocation8 + $0x7c8] sm:$0xff] }
 0x315   :  { %3850 = vmatprep.subr.bf16.mxu1 %v5272_v41  ;;  %3932 = vmatprep.subr.bf16.mxu0 %v5274_v42  ;;  %v2468_v41 = vld [vmem:[#allocation8 + $0x7e8] sm:$0xff]  ;;  %v5319_v42 = vcombine.low %v2455_v29, %v2459_v30  ;;  %v5328_v45 = vcombine.high %v2463_v36, %v2467_v39 }
 0x316   :  { %v5330_v46 = vcombine.high %v2464_v40, %v2468_v41  ;;  %v5329_v53 = vcombine.low %v2464_v40, %v2468_v41  ;;  %v2265_v40 = vld [vmem:[#allocation8 + $0x190] sm:$0xff] }
 0x317   :  { %v2269_v41 = vld [vmem:[#allocation8 + $0x1b0] sm:$0xff] }
 0x318   :  { %3851 = vmatpush1.bf16.msra.mxu1 %v5271_v47  ;;  %3933 = vmatpush1.bf16.msra.mxu0 %v5273_v48  ;;  %v2217_v47 = vld [vmem:[#allocation8 + $0x10] sm:$0xff]  ;;  %v2218_v48 = vld [vmem:[#allocation8 + $0x18] sm:$0xff] }
 0x319   :  { %3852 = vmatprep.subr.bf16.mxu1 %v5280_v49  ;;  %3934 = vmatprep.subr.bf16.mxu0 %v5282_v50  ;;  %v2222_v49 = vld [vmem:[#allocation8 + $0x38] sm:$0xff]  ;;  %v5327_v50 = vcombine.low %v2463_v36, %v2467_v39  ;;  %v5084_v55 = vcombine.high %v2217_v47, %v2221_v6 }
 0x31a   :  { %v5086_v56 = vcombine.high %v2218_v48, %v2222_v49  ;;  %v5085_v62 = vcombine.low %v2218_v48, %v2222_v49  ;;  %v2277_v48 = vld [vmem:[#allocation8 + $0x1f0] sm:$0xff]  ;;  %v2274_v49 = vld [vmem:[#allocation8 + $0x1d8] sm:$0xff] }
 0x31c   :  { %3853 = vmatpush1.bf16.msra.mxu1 %v5279_v57  ;;  %3935 = vmatpush1.bf16.msra.mxu0 %v5281_v58  ;;  %v2225_v57 = vld [vmem:[#allocation8 + $0x50] sm:$0xff] }
 0x31d   :  { %3854 = vmatprep.subr.bf16.mxu1 %v5288_v59  ;;  %3936 = vmatprep.subr.bf16.mxu0 %v5290_v60  ;;  %v2229_v58 = vld [vmem:[#allocation8 + $0x70] sm:$0xff]  ;;  %v2230_v59 = vld [vmem:[#allocation8 + $0x78] sm:$0xff]  ;;  %v5083_v60 = vcombine.low %v2217_v47, %v2221_v6 }
 0x31e   :  { %v5092_v63 = vcombine.high %v2225_v57, %v2229_v58  ;;  %v5094_v1 = vcombine.high %v2226_v21, %v2230_v59  ;;  %v5091_v7 = vcombine.low %v2225_v57, %v2229_v58  ;;  %v5093_v8 = vcombine.low %v2226_v21, %v2230_v59  ;;  %v2273_v6 = vld [vmem:[#allocation8 + $0x1d0] sm:$0xff]  ;;  %v2282_v21 = vld [vmem:[#allocation8 + $0x218] sm:$0xff] }
 0x31f   :  { %v2281_v57 = vld [vmem:[#allocation8 + $0x210] sm:$0xff]  ;;  %v2286_v59 = vld [vmem:[#allocation8 + $0x238] sm:$0xff] }
 0x320   :  { %3855 = vmatpush1.bf16.msra.mxu1 %v5287_v2  ;;  %3937 = vmatpush1.bf16.msra.mxu0 %v5289_v3  ;;  %v2233_v2 = vld [vmem:[#allocation8 + $0x90] sm:$0xff] }
 0x321   :  { %3856 = vmatprep.subr.bf16.mxu1 %v5296_v4  ;;  %3938 = vmatprep.subr.bf16.mxu0 %v5298_v5  ;;  %v2237_v3 = vld [vmem:[#allocation8 + $0xb0] sm:$0xff]  ;;  %v2234_v4 = vld [vmem:[#allocation8 + $0x98] sm:$0xff] }
 0x322   :  { %v2238_v5 = vld [vmem:[#allocation8 + $0xb8] sm:$0xff]  ;;  %v5100_v9 = vcombine.high %v2233_v2, %v2237_v3  ;;  %v5099_v18 = vcombine.low %v2233_v2, %v2237_v3  ;;  %v2285_v58 = vld [vmem:[#allocation8 + $0x230] sm:$0xff] }
 0x323   :  { %v5102_v12 = vcombine.high %v2234_v4, %v2238_v5  ;;  %v5101_v19 = vcombine.low %v2234_v4, %v2238_v5  ;;  %v2289_v2 = vld [vmem:[#allocation8 + $0x250] sm:$0xff]  ;;  %v2290_v4 = vld [vmem:[#allocation8 + $0x258] sm:$0xff] }
 0x324   :  { %3857 = vmatpush1.bf16.msra.mxu1 %v5295_v13  ;;  %3939 = vmatpush1.bf16.msra.mxu0 %v5297_v14  ;;  %v2241_v13 = vld [vmem:[#allocation8 + $0xd0] sm:$0xff]  ;;  %v2294_v5 = vld [vmem:[#allocation8 + $0x278] sm:$0xff] }
 0x325   :  { %3858 = vmatprep.subr.bf16.mxu1 %v5304_v16  ;;  %3940 = vmatprep.subr.bf16.mxu0 %v5306_v17  ;;  %v2245_v14 = vld [vmem:[#allocation8 + $0xf0] sm:$0xff]  ;;  %v2242_v16 = vld [vmem:[#allocation8 + $0xd8] sm:$0xff] }
 0x326   :  { %v2246_v17 = vld [vmem:[#allocation8 + $0xf8] sm:$0xff]  ;;  %v5108_v20 = vcombine.high %v2241_v13, %v2245_v14  ;;  %v2293_v3 = vld [vmem:[#allocation8 + $0x270] sm:$0xff] }
 0x327   :  { %v5110_v22 = vcombine.high %v2242_v16, %v2246_v17  ;;  %v5109_v29 = vcombine.low %v2242_v16, %v2246_v17  ;;  %v2298_v16 = vld [vmem:[#allocation8 + $0x298] sm:$0xff] }
 0x328   :  { %3859 = vmatpush1.bf16.msra.mxu1 %v5303_v23  ;;  %3941 = vmatpush1.bf16.msra.mxu0 %v5305_v24  ;;  %v2249_v23 = vld [vmem:[#allocation8 + $0x110] sm:$0xff]  ;;  %v2302_v17 = vld [vmem:[#allocation8 + $0x2b8] sm:$0xff] }
 0x329   :  { %3860 = vmatprep.subr.bf16.mxu1 %v5312_v26  ;;  %3942 = vmatprep.subr.bf16.mxu0 %v5314_v28  ;;  %v2253_v24 = vld [vmem:[#allocation8 + $0x130] sm:$0xff]  ;;  %v2254_v26 = vld [vmem:[#allocation8 + $0x138] sm:$0xff]  ;;  %v5107_v28 = vcombine.low %v2241_v13, %v2245_v14 }
 0x32a   :  { %v5116_v30 = vcombine.high %v2249_v23, %v2253_v24  ;;  %v2297_v13 = vld [vmem:[#allocation8 + $0x290] sm:$0xff] }
 0x32b   :  { %v2301_v14 = vld [vmem:[#allocation8 + $0x2b0] sm:$0xff] }
 0x32c   :  { %3861 = vmatpush1.bf16.msra.mxu1 %v5311_v33  ;;  %3943 = vmatpush1.bf16.msra.mxu0 %v5313_v25  ;;  %v2261_v33 = vld [vmem:[#allocation8 + $0x170] sm:$0xff]  ;;  %v2258_v25 = vld [vmem:[#allocation8 + $0x158] sm:$0xff] }
 0x32d   :  { %3862 = vmatprep.subr.bf16.mxu1 %v5320_v34  ;;  %3944 = vmatprep.subr.bf16.mxu0 %v5322_v35  ;;  %v5115_v34 = vcombine.low %v2249_v23, %v2253_v24  ;;  %v5124_v36 = vcombine.high %v2257_v32, %v2261_v33  ;;  %v5126_v39 = vcombine.high %v2258_v25, %v2262_v27  ;;  %v2305_v23 = vld [vmem:[#allocation8 + $0x2d0] sm:$0xff] }
 0x32e   :  { %v5123_v43 = vcombine.low %v2257_v32, %v2261_v33  ;;  %v2309_v24 = vld [vmem:[#allocation8 + $0x2f0] sm:$0xff] }
 0x32f   :  { %v2313_v32 = vld [vmem:[#allocation8 + $0x310] sm:$0xff] }
 0x330   :  { %3863 = vmatpush1.bf16.msra.mxu1 %v5319_v42  ;;  %3945 = vmatpush1.bf16.msra.mxu0 %v5321_v0  ;;  %v2266_v42 = vld [vmem:[#allocation8 + $0x198] sm:$0xff]  ;;  %v2317_v33 = vld [vmem:[#allocation8 + $0x330] sm:$0xff] }
 0x331   :  { %3864 = vmatprep.subr.bf16.mxu1 %v5328_v45  ;;  %3946 = vmatprep.subr.bf16.mxu0 %v5330_v46  ;;  %v2270_v0 = vld [vmem:[#allocation8 + $0x1b8] sm:$0xff]  ;;  %v5125_v45 = vcombine.low %v2258_v25, %v2262_v27  ;;  %v5132_v46 = vcombine.high %v2265_v40, %v2269_v41 }
 0x332   :  { %v5134_v47 = vcombine.high %v2266_v42, %v2270_v0  ;;  %v5133_v54 = vcombine.low %v2266_v42, %v2270_v0  ;;  %v2314_v25 = vld [vmem:[#allocation8 + $0x318] sm:$0xff] }
 0x333   :  { %v2318_v27 = vld [vmem:[#allocation8 + $0x338] sm:$0xff] }
 0x334   :  { %3865 = vmatpush1.bf16.msra.mxu1 %v5327_v50  ;;  %3947 = vmatpush1.bf16.msra.mxu0 %v5329_v53  ;;  %v2278_v50 = vld [vmem:[#allocation8 + $0x1f8] sm:$0xff]  ;;  %v5131_v53 = vcombine.low %v2265_v40, %v2269_v41  ;;  %v2321_v40 = vld [vmem:[#allocation8 + $0x350] sm:$0xff] }
 0x335   :  { %3957 = vmatprep.subr.bf16.mxu1 %v5084_v55  ;;  %4039 = vmatprep.subr.bf16.mxu0 %v5086_v56  ;;  %v5140_v55 = vcombine.high %v2273_v6, %v2277_v48  ;;  %v5142_v56 = vcombine.high %v2274_v49, %v2278_v50  ;;  %v2325_v41 = vld [vmem:[#allocation8 + $0x370] sm:$0xff]  ;;  %v2322_v42 = vld [vmem:[#allocation8 + $0x358] sm:$0xff] }
 0x336   :  { %v2326_v0 = vld [vmem:[#allocation8 + $0x378] sm:$0xff] }
 0x337   :  { %3867 = vmatmul.mubr.bf16.vlgmr.msra.gmra.mrb[24].mxu1 %v6378_v61  ;;  %3949 = vmatmul.mubr.bf16.vlgmr.msra.gmra.mrb[8].mxu0 %v6378_v61 }
 0x338   :  { %3958 = vmatpush1.bf16.msra.mxu1 %v5083_v60  ;;  %3989 = vmatprep.mubr.bf16.mxu1 %v6363_v37  ;;  %v5139_v60 = vcombine.low %v2273_v6, %v2277_v48  ;;  %v2329_v6 = vld [vmem:[#allocation8 + $0x390] sm:$0xff] }
 0x339   :  { %4040 = vmatpush1.bf16.msra.mxu0 %v5085_v62  ;;  %4071 = vmatprep.mubr.bf16.mxu0 %v6363_v37  ;;  %v2250_v37 = vld [vmem:[#allocation8 + $0x118] sm:$0xff]  ;;  %v5141_v62 = vcombine.low %v2274_v49, %v2278_v50  ;;  %v2333_v48 = vld [vmem:[#allocation8 + $0x3b0] sm:$0xff] }
 0x33a   :  { %3959 = vmatprep.subr.bf16.mxu1 %v5092_v63  ;;  %4041 = vmatprep.subr.bf16.mxu0 %v5094_v1  ;;  %v5118_v31 = vcombine.high %v2250_v37, %v2254_v26  ;;  %v5117_v35 = vcombine.low %v2250_v37, %v2254_v26  ;;  %v5148_v63 = vcombine.high %v2281_v57, %v2285_v58  ;;  %v2306_v37 = vld [vmem:[#allocation8 + $0x2d8] sm:$0xff] }
 0x33b   :  { %v5150_v1 = vcombine.high %v2282_v21, %v2286_v59  ;;  %v2310_v26 = vld [vmem:[#allocation8 + $0x2f8] sm:$0xff] }
 0x33c   :  { %3960 = vmatpush1.bf16.msra.mxu1 %v5091_v7  ;;  %v5147_v7 = vcombine.low %v2281_v57, %v2285_v58  ;;  %v2330_v49 = vld [vmem:[#allocation8 + $0x398] sm:$0xff]  ;;  %v2337_v57 = vld [vmem:[#allocation8 + $0x3d0] sm:$0xff] }
 0x33d   :  { %4042 = vmatpush1.bf16.msra.mxu0 %v5093_v8  ;;  %3961 = vmatprep.subr.bf16.mxu1 %v5100_v9  ;;  %v5149_v8 = vcombine.low %v2282_v21, %v2286_v59  ;;  %v5156_v9 = vcombine.high %v2289_v2, %v2293_v3  ;;  %v2334_v50 = vld [vmem:[#allocation8 + $0x3b8] sm:$0xff]  ;;  %v2341_v58 = vld [vmem:[#allocation8 + $0x3f0] sm:$0xff] }
 0x33e   :  { %4043 = vmatprep.subr.bf16.mxu0 %v5102_v12  ;;  %v5158_v12 = vcombine.high %v2290_v4, %v2294_v5  ;;  %v2338_v21 = vld [vmem:[#allocation8 + $0x3d8] sm:$0xff] }
 0x33f   :  { %v2342_v59 = vld [vmem:[#allocation8 + $0x3f8] sm:$0xff] }
 0x340   :  { %3962 = vmatpush1.bf16.msra.mxu1 %v5099_v18  ;;  %v5155_v18 = vcombine.low %v2289_v2, %v2293_v3  ;;  %v2345_v2 = vld [vmem:[#allocation8 + $0x410] sm:$0xff] }
 0x341   :  { %4044 = vmatpush1.bf16.msra.mxu0 %v5101_v19  ;;  %3963 = vmatprep.subr.bf16.mxu1 %v5108_v20  ;;  %v5157_v19 = vcombine.low %v2290_v4, %v2294_v5  ;;  %v5164_v20 = vcombine.high %v2297_v13, %v2301_v14  ;;  %v2349_v3 = vld [vmem:[#allocation8 + $0x430] sm:$0xff]  ;;  %v2346_v4 = vld [vmem:[#allocation8 + $0x418] sm:$0xff] }
 0x342   :  { %4045 = vmatprep.subr.bf16.mxu0 %v5110_v22  ;;  %v5166_v22 = vcombine.high %v2298_v16, %v2302_v17  ;;  %v2350_v5 = vld [vmem:[#allocation8 + $0x438] sm:$0xff] }
 0x344   :  { %3964 = vmatpush1.bf16.msra.mxu1 %v5107_v28  ;;  %v5163_v28 = vcombine.low %v2297_v13, %v2301_v14  ;;  %v2353_v13 = vld [vmem:[#allocation8 + $0x450] sm:$0xff] }
 0x345   :  { %4046 = vmatpush1.bf16.msra.mxu0 %v5109_v29  ;;  %3965 = vmatprep.subr.bf16.mxu1 %v5116_v30  ;;  %v5165_v29 = vcombine.low %v2298_v16, %v2302_v17  ;;  %v5172_v30 = vcombine.high %v2305_v23, %v2309_v24  ;;  %v2357_v14 = vld [vmem:[#allocation8 + $0x470] sm:$0xff]  ;;  %v5211_v16 = vcombine.low %v2345_v2, %v2349_v3  ;;  %v2354_v17 = vld [vmem:[#allocation8 + $0x458] sm:$0xff] }
 0x346   :  { %4047 = vmatprep.subr.bf16.mxu0 %v5118_v31  ;;  %v5174_v31 = vcombine.high %v2306_v37, %v2310_v26 }
 0x348   :  { %3966 = vmatpush1.bf16.msra.mxu1 %v5115_v34  ;;  %v5171_v34 = vcombine.low %v2305_v23, %v2309_v24  ;;  %v2365_v23 = vld [vmem:[#allocation8 + $0x4b0] sm:$0xff] }
 0x349   :  { %4048 = vmatpush1.bf16.msra.mxu0 %v5117_v35  ;;  %3967 = vmatprep.subr.bf16.mxu1 %v5124_v36  ;;  %v5173_v35 = vcombine.low %v2306_v37, %v2310_v26  ;;  %v5180_v36 = vcombine.high %v2313_v32, %v2317_v33  ;;  %v2362_v37 = vld [vmem:[#allocation8 + $0x498] sm:$0xff] }
 0x34a   :  { %4049 = vmatprep.subr.bf16.mxu0 %v5126_v39  ;;  %v5182_v39 = vcombine.high %v2314_v25, %v2318_v27  ;;  %v2366_v26 = vld [vmem:[#allocation8 + $0x4b8] sm:$0xff] }
 0x34c   :  { %3968 = vmatpush1.bf16.msra.mxu1 %v5123_v43  ;;  %v5179_v43 = vcombine.low %v2313_v32, %v2317_v33  ;;  %v2369_v32 = vld [vmem:[#allocation8 + $0x4d0] sm:$0xff] }
 0x34d   :  { %4050 = vmatpush1.bf16.msra.mxu0 %v5125_v45  ;;  %3969 = vmatprep.subr.bf16.mxu1 %v5132_v46  ;;  %v5181_v45 = vcombine.low %v2314_v25, %v2318_v27  ;;  %v5188_v46 = vcombine.high %v2321_v40, %v2325_v41  ;;  %v2373_v33 = vld [vmem:[#allocation8 + $0x4f0] sm:$0xff]  ;;  %v2370_v25 = vld [vmem:[#allocation8 + $0x4d8] sm:$0xff] }
 0x34e   :  { %4051 = vmatprep.subr.bf16.mxu0 %v5134_v47  ;;  %v5190_v47 = vcombine.high %v2322_v42, %v2326_v0  ;;  %v2374_v27 = vld [vmem:[#allocation8 + $0x4f8] sm:$0xff] }
 0x350   :  { %3970 = vmatpush1.bf16.msra.mxu1 %v5131_v53  ;;  %v5187_v53 = vcombine.low %v2321_v40, %v2325_v41  ;;  %v2381_v40 = vld [vmem:[#allocation8 + $0x530] sm:$0xff]  ;;  %v2378_v41 = vld [vmem:[#allocation8 + $0x518] sm:$0xff] }
 0x351   :  { %4052 = vmatpush1.bf16.msra.mxu0 %v5133_v54  ;;  %3971 = vmatprep.subr.bf16.mxu1 %v5140_v55  ;;  %v5189_v54 = vcombine.low %v2322_v42, %v2326_v0  ;;  %v5196_v55 = vcombine.high %v2329_v6, %v2333_v48  ;;  %v2382_v42 = vld [vmem:[#allocation8 + $0x538] sm:$0xff]  ;;  %v5237_v0 = vcombine.low %v2370_v25, %v2374_v27 }
 0x352   :  { %4053 = vmatprep.subr.bf16.mxu0 %v5142_v56  ;;  %v5198_v56 = vcombine.high %v2330_v49, %v2334_v50 }
 0x354   :  { %3972 = vmatpush1.bf16.msra.mxu1 %v5139_v60  ;;  %v5195_v60 = vcombine.low %v2329_v6, %v2333_v48  ;;  %v2386_v6 = vld [vmem:[#allocation8 + $0x558] sm:$0xff] }
 0x355   :  { %4054 = vmatpush1.bf16.msra.mxu0 %v5141_v62  ;;  %3973 = vmatprep.subr.bf16.mxu1 %v5148_v63  ;;  %v5197_v62 = vcombine.low %v2330_v49, %v2334_v50  ;;  %v5204_v63 = vcombine.high %v2337_v57, %v2341_v58  ;;  %v2390_v48 = vld [vmem:[#allocation8 + $0x578] sm:$0xff]  ;;  %v5245_v50 = vcombine.low %v2378_v41, %v2382_v42 }
 0x356   :  { %4055 = vmatprep.subr.bf16.mxu0 %v5150_v1  ;;  %v5206_v1 = vcombine.high %v2338_v21, %v2342_v59 }
 0x358   :  { %3974 = vmatpush1.bf16.msra.mxu1 %v5147_v7  ;;  %v5203_v7 = vcombine.low %v2337_v57, %v2341_v58  ;;  %v2394_v57 = vld [vmem:[#allocation8 + $0x598] sm:$0xff] }
 0x359   :  { %4056 = vmatpush1.bf16.msra.mxu0 %v5149_v8  ;;  %3975 = vmatprep.subr.bf16.mxu1 %v5156_v9  ;;  %v5205_v8 = vcombine.low %v2338_v21, %v2342_v59  ;;  %v5212_v9 = vcombine.high %v2345_v2, %v2349_v3  ;;  %v2398_v58 = vld [vmem:[#allocation8 + $0x5b8] sm:$0xff]  ;;  %v5253_v59 = vcombine.low %v2386_v6, %v2390_v48 }
 0x35a   :  { %4057 = vmatprep.subr.bf16.mxu0 %v5158_v12  ;;  %v5214_v12 = vcombine.high %v2346_v4, %v2350_v5  ;;  %v2402_v2 = vld [vmem:[#allocation8 + $0x5d8] sm:$0xff] }
 0x35b   :  { %v2406_v3 = vld [vmem:[#allocation8 + $0x5f8] sm:$0xff] }
 0x35c   :  { %3976 = vmatpush1.bf16.msra.mxu1 %v5155_v18  ;;  %v2358_v18 = vld [vmem:[#allocation8 + $0x478] sm:$0xff] }
 0x35d   :  { %4058 = vmatpush1.bf16.msra.mxu0 %v5157_v19  ;;  %3977 = vmatprep.subr.bf16.mxu1 %v5164_v20  ;;  %v5213_v19 = vcombine.low %v2346_v4, %v2350_v5  ;;  %v5220_v20 = vcombine.high %v2353_v13, %v2357_v14  ;;  %v5222_v24 = vcombine.high %v2354_v17, %v2358_v18 }
 0x35e   :  { %4059 = vmatprep.subr.bf16.mxu0 %v5166_v22  ;;  %v2361_v22 = vld [vmem:[#allocation8 + $0x490] sm:$0xff]  ;;  %v5261_v5 = vcombine.low %v2394_v57, %v2398_v58 }
 0x360   :  { %3978 = vmatpush1.bf16.msra.mxu1 %v5163_v28  ;;  %v5219_v28 = vcombine.low %v2353_v13, %v2357_v14  ;;  %v2410_v13 = vld [vmem:[#allocation8 + $0x618] sm:$0xff] }
 0x361   :  { %4060 = vmatpush1.bf16.msra.mxu0 %v5165_v29  ;;  %3979 = vmatprep.subr.bf16.mxu1 %v5172_v30  ;;  %v5221_v29 = vcombine.low %v2354_v17, %v2358_v18  ;;  %v5228_v30 = vcombine.high %v2361_v22, %v2365_v23  ;;  %v2414_v14 = vld [vmem:[#allocation8 + $0x638] sm:$0xff]  ;;  %v5269_v17 = vcombine.low %v2402_v2, %v2406_v3 }
 0x362   :  { %4061 = vmatprep.subr.bf16.mxu0 %v5174_v31  ;;  %v5230_v31 = vcombine.high %v2362_v37, %v2366_v26 }
 0x364   :  { %3980 = vmatpush1.bf16.msra.mxu1 %v5171_v34  ;;  %v5227_v34 = vcombine.low %v2361_v22, %v2365_v23  ;;  %v2421_v22 = vld [vmem:[#allocation8 + $0x670] sm:$0xff]  ;;  %v2418_v23 = vld [vmem:[#allocation8 + $0x658] sm:$0xff] }
 0x365   :  { %4062 = vmatpush1.bf16.msra.mxu0 %v5173_v35  ;;  %3981 = vmatprep.subr.bf16.mxu1 %v5180_v36  ;;  %v5236_v35 = vcombine.high %v2369_v32, %v2373_v33  ;;  %v5238_v36 = vcombine.high %v2370_v25, %v2374_v27 }
 0x366   :  { %4063 = vmatprep.subr.bf16.mxu0 %v5182_v39  ;;  %v2377_v39 = vld [vmem:[#allocation8 + $0x510] sm:$0xff] }
 0x367   :  { %v5243_v49 = vcombine.low %v2377_v39, %v2381_v40 }
 0x368   :  { %3982 = vmatpush1.bf16.msra.mxu1 %v5179_v43  ;;  %v5244_v43 = vcombine.high %v2377_v39, %v2381_v40  ;;  %v2434_v39 = vld [vmem:[#allocation8 + $0x6d8] sm:$0xff] }
 0x369   :  { %4064 = vmatpush1.bf16.msra.mxu0 %v5181_v45  ;;  %3983 = vmatprep.subr.bf16.mxu1 %v5188_v46  ;;  %v5246_v45 = vcombine.high %v2378_v41, %v2382_v42  ;;  %v2385_v46 = vld [vmem:[#allocation8 + $0x550] sm:$0xff]  ;;  %v2438_v40 = vld [vmem:[#allocation8 + $0x6f8] sm:$0xff] }
 0x36a   :  { %4065 = vmatprep.subr.bf16.mxu0 %v5190_v47  ;;  %v2389_v47 = vld [vmem:[#allocation8 + $0x570] sm:$0xff] }
 0x36b   :  { %v5251_v21 = vcombine.low %v2385_v46, %v2389_v47 }
 0x36c   :  { %3984 = vmatpush1.bf16.msra.mxu1 %v5187_v53  ;;  %v5252_v53 = vcombine.high %v2385_v46, %v2389_v47  ;;  %v2442_v46 = vld [vmem:[#allocation8 + $0x718] sm:$0xff] }
 0x36d   :  { %4066 = vmatpush1.bf16.msra.mxu0 %v5189_v54  ;;  %3985 = vmatprep.subr.bf16.mxu1 %v5196_v55  ;;  %v5254_v54 = vcombine.high %v2386_v6, %v2390_v48  ;;  %v2393_v55 = vld [vmem:[#allocation8 + $0x590] sm:$0xff]  ;;  %v2446_v47 = vld [vmem:[#allocation8 + $0x738] sm:$0xff]  ;;  %v5301_v48 = vcombine.low %v2434_v39, %v2438_v40 }
 0x36e   :  { %4067 = vmatprep.subr.bf16.mxu0 %v5198_v56  ;;  %v2397_v56 = vld [vmem:[#allocation8 + $0x5b0] sm:$0xff] }
 0x36f   :  { %v5259_v4 = vcombine.low %v2393_v55, %v2397_v56 }
 0x370   :  { %3986 = vmatpush1.bf16.msra.mxu1 %v5195_v60  ;;  %v5260_v60 = vcombine.high %v2393_v55, %v2397_v56  ;;  %v2450_v55 = vld [vmem:[#allocation8 + $0x758] sm:$0xff] }
 0x371   :  { %4068 = vmatpush1.bf16.msra.mxu0 %v5197_v62  ;;  %3987 = vmatprep.subr.bf16.mxu1 %v5204_v63  ;;  %v5262_v62 = vcombine.high %v2394_v57, %v2398_v58  ;;  %v2401_v63 = vld [vmem:[#allocation8 + $0x5d0] sm:$0xff]  ;;  %v2454_v56 = vld [vmem:[#allocation8 + $0x778] sm:$0xff]  ;;  %v5309_v58 = vcombine.low %v2442_v46, %v2446_v47 }
 0x372   :  { %4069 = vmatprep.subr.bf16.mxu0 %v5206_v1  ;;  %v2405_v1 = vld [vmem:[#allocation8 + $0x5f0] sm:$0xff] }
 0x374   :  { %3988 = vmatpush1.bf16.msra.mxu1 %v5203_v7  ;;  %v5268_v7 = vcombine.high %v2401_v63, %v2405_v1 }
 0x375   :  { %4070 = vmatpush1.bf16.msra.mxu0 %v5205_v8  ;;  %3998 = vmatprep.subr.bf16.mxu1 %v5212_v9  ;;  %v5270_v8 = vcombine.high %v2402_v2, %v2406_v3  ;;  %v2409_v9 = vld [vmem:[#allocation8 + $0x610] sm:$0xff]  ;;  %v5317_v3 = vcombine.low %v2450_v55, %v2454_v56 }
 0x376   :  { %4080 = vmatprep.subr.bf16.mxu0 %v5214_v12  ;;  %v2413_v12 = vld [vmem:[#allocation8 + $0x630] sm:$0xff] }
 0x377   :  { %3990 = vmatmul.mubr.bf16.vlgmr.msra.gmra.mrb[28].mxu1 %v6365_v38  ;;  %v5276_v18 = vcombine.high %v2409_v9, %v2413_v12 }
 0x378   :  { %4072 = vmatmul.mubr.bf16.vlgmr.msra.gmra.mrb[12].mxu0 %v6365_v38  ;;  %3999 = vmatpush1.bf16.msra.mxu1 %v5211_v16  ;;  %v5229_v38 = vcombine.low %v2362_v37, %v2366_v26  ;;  %v5267_v16 = vcombine.low %v2401_v63, %v2405_v1  ;;  %v5275_v37 = vcombine.low %v2409_v9, %v2413_v12  ;;  %v2458_v63 = vld [vmem:[#allocation8 + $0x798] sm:$0xff] }
 0x379   :  { %4030 = vmatprep.mubr.bf16.mxu1 %v6369_v44  ;;  %4081 = vmatpush1.bf16.msra.mxu0 %v5213_v19  ;;  %v5278_v19 = vcombine.high %v2410_v13, %v2414_v14  ;;  %v5277_v26 = vcombine.low %v2410_v13, %v2414_v14  ;;  %v2462_v1 = vld [vmem:[#allocation8 + $0x7b8] sm:$0xff] }
 0x37a   :  { %4112 = vmatprep.mubr.bf16.mxu0 %v6369_v44  ;;  %4000 = vmatprep.subr.bf16.mxu1 %v5220_v20  ;;  %v5235_v44 = vcombine.low %v2369_v32, %v2373_v33  ;;  %v2417_v20 = vld [vmem:[#allocation8 + $0x650] sm:$0xff]  ;;  %v2426_v32 = vld [vmem:[#allocation8 + $0x698] sm:$0xff]  ;;  %v5325_v14 = vcombine.low %v2458_v63, %v2462_v1 }
 0x37b   :  { %4082 = vmatprep.subr.bf16.mxu0 %v5222_v24  ;;  %v2422_v24 = vld [vmem:[#allocation8 + $0x678] sm:$0xff]  ;;  %v5283_v25 = vcombine.low %v2417_v20, %v2421_v22 }
 0x37c   :  { %4001 = vmatpush1.bf16.msra.mxu1 %v5219_v28  ;;  %v5284_v28 = vcombine.high %v2417_v20, %v2421_v22  ;;  %v2430_v33 = vld [vmem:[#allocation8 + $0x6b8] sm:$0xff]  ;;  %v5285_v27 = vcombine.low %v2418_v23, %v2422_v24  ;;  %v5967_v20 = vld [vmem:[#allocation10 + $0x40] sm:$0xff]  }
 0x37d   :  { %4083 = vmatpush1.bf16.msra.mxu0 %v5221_v29  ;;  %4002 = vmatprep.subr.bf16.mxu1 %v5228_v30  ;;  %v5286_v29 = vcombine.high %v2418_v23, %v2422_v24  ;;  %v2425_v30 = vld [vmem:[#allocation8 + $0x690] sm:$0xff]  ;;  %v5293_v42 = vcombine.low %v2426_v32, %v2430_v33  ;;  %v2466_v9 = vld [vmem:[#allocation8 + $0x7d8] sm:$0xff]  ;;  %v6000_v22 = vld [vmem:[#allocation10 + $0x1c0] sm:$0xff]  }
 0x37e   :  { %4084 = vmatprep.subr.bf16.mxu0 %v5230_v31  ;;  %v2429_v31 = vld [vmem:[#allocation8 + $0x6b0] sm:$0xff]  ;;  %v2470_v12 = vld [vmem:[#allocation8 + $0x7f8] sm:$0xff]  ;;  %v5968_v23 = vld [vmem:[#allocation10] sm:$0xff]  }
 0x37f   :  { %v5291_v41 = vcombine.low %v2425_v30, %v2429_v31  ;;  %v5969_v24 = vld [vmem:[#allocation10 + $0x48] sm:$0xff]  }
 0x380   :  { %4003 = vmatpush1.bf16.msra.mxu1 %v5227_v34  ;;  %v5292_v34 = vcombine.high %v2425_v30, %v2429_v31  ;;  %v6006_v30 = vld [vmem:[#allocation10 + $0x188] sm:$0xff]   ;;  %v6008_v31 = vld [vmem:[#allocation10 + $0x1d0] sm:$0xff]  }
 0x381   :  { %4085 = vmatpush1.bf16.msra.mxu0 %v5229_v38  ;;  %4004 = vmatprep.subr.bf16.mxu1 %v5236_v35  ;;  %v5294_v38 = vcombine.high %v2426_v32, %v2430_v33  ;;  %v2433_v35 = vld [vmem:[#allocation8 + $0x6d0] sm:$0xff]  ;;  %v5973_v33 = vld [vmem:[#allocation10 + $0x58] sm:$0xff]  }
 0x382   :  { %4086 = vmatprep.subr.bf16.mxu0 %v5238_v36  ;;  %v2437_v36 = vld [vmem:[#allocation8 + $0x6f0] sm:$0xff] }
 0x383   :  { %v5299_v6 = vcombine.low %v2433_v35, %v2437_v36  ;;  %v5972_v32 = vld [vmem:[#allocation10 + $0x10] sm:$0xff]  }
 0x384   :  { %4005 = vmatpush1.bf16.msra.mxu1 %v5235_v44  ;;  %v5300_v44 = vcombine.high %v2433_v35, %v2437_v36  ;;  %v6016_v35 = vld [vmem:[#allocation10 + $0x1e0] sm:$0xff]  }
 0x385   :  { %4087 = vmatpush1.bf16.msra.mxu0 %v5237_v0  ;;  %4006 = vmatprep.subr.bf16.mxu1 %v5244_v43  ;;  %v5302_v0 = vcombine.high %v2434_v39, %v2438_v40  ;;  %v2441_v43 = vld [vmem:[#allocation8 + $0x710] sm:$0xff]  ;;  %v5976_v36 = vld [vmem:[#allocation10 + $0x20] sm:$0xff]   ;;  %v5977_v39 = vld [vmem:[#allocation10 + $0x68] sm:$0xff]  }
 0x386   :  { %4088 = vmatprep.subr.bf16.mxu0 %v5246_v45  ;;  %v2445_v45 = vld [vmem:[#allocation8 + $0x730] sm:$0xff]  ;;  %v6018_v40 = vld [vmem:[#allocation10 + $0x1a0] sm:$0xff]  }
 0x387   :  { %v5307_v57 = vcombine.low %v2441_v43, %v2445_v45 }
 0x388   :  { %4007 = vmatpush1.bf16.msra.mxu1 %v5243_v49  ;;  %v5308_v49 = vcombine.high %v2441_v43, %v2445_v45  ;;  %v5980_v43 = vld [vmem:[#allocation10 + $0x30] sm:$0xff]   ;;  %v5981_v45 = vld [vmem:[#allocation10 + $0x78] sm:$0xff]  }
 0x389   :  { %4089 = vmatpush1.bf16.msra.mxu0 %v5245_v50  ;;  %4008 = vmatprep.subr.bf16.mxu1 %v5252_v53  ;;  %v5310_v50 = vcombine.high %v2442_v46, %v2446_v47  ;;  %v2449_v53 = vld [vmem:[#allocation8 + $0x750] sm:$0xff]  ;;  %v5982_v46 = vld [vmem:[#allocation10 + $0x38] sm:$0xff]   ;;  %v5983_v47 = vld [vmem:[#allocation10 + $0xc0] sm:$0xff]  }
 0x38a   :  { %4090 = vmatprep.subr.bf16.mxu0 %v5254_v54  ;;  %v2453_v54 = vld [vmem:[#allocation8 + $0x770] sm:$0xff] }
 0x38b   :  { %v5315_v2 = vcombine.low %v2449_v53, %v2453_v54 }
 0x38c   :  { %4009 = vmatpush1.bf16.msra.mxu1 %v5251_v21  ;;  %v5316_v21 = vcombine.high %v2449_v53, %v2453_v54 }
 0x38d   :  { %4091 = vmatpush1.bf16.msra.mxu0 %v5253_v59  ;;  %4010 = vmatprep.subr.bf16.mxu1 %v5260_v60  ;;  %v5318_v59 = vcombine.high %v2450_v55, %v2454_v56  ;;  %v2457_v60 = vld [vmem:[#allocation8 + $0x790] sm:$0xff] }
 0x38e   :  { %4092 = vmatprep.subr.bf16.mxu0 %v5262_v62  ;;  %v2461_v62 = vld [vmem:[#allocation8 + $0x7b0] sm:$0xff] }
 0x38f   :  { %v5323_v13 = vcombine.low %v2457_v60, %v2461_v62 }
 0x390   :  { %4011 = vmatpush1.bf16.msra.mxu1 %v5259_v4  ;;  %v5324_v4 = vcombine.high %v2457_v60, %v2461_v62 }
 0x391   :  { %4093 = vmatpush1.bf16.msra.mxu0 %v5261_v5  ;;  %4012 = vmatprep.subr.bf16.mxu1 %v5268_v7  ;;  %v5326_v5 = vcombine.high %v2458_v63, %v2462_v1  ;;  %v2465_v7 = vld [vmem:[#allocation8 + $0x7d0] sm:$0xff] }
 0x392   :  { %4094 = vmatprep.subr.bf16.mxu0 %v5270_v8  ;;  %v2469_v8 = vld [vmem:[#allocation8 + $0x7f0] sm:$0xff] }
 0x393   :  { %v6026_v63 = vld [vmem:[#allocation10 + $0x1b0] sm:$0xff]  }
 0x394   :  { %4013 = vmatpush1.bf16.msra.mxu1 %v5267_v16  ;;  %v5332_v16 = vcombine.high %v2465_v7, %v2469_v8 }
 0x395   :  { %4095 = vmatpush1.bf16.msra.mxu0 %v5269_v17  ;;  %4014 = vmatprep.subr.bf16.mxu1 %v5276_v18  ;;  %v5334_v17 = vcombine.high %v2466_v9, %v2470_v12  ;;  %v5331_v18 = vcombine.low %v2465_v7, %v2469_v8  ;;  %v6030_v7 = vld [vmem:[#allocation10 + $0x1b8] sm:$0xff]  }
 0x396   :  { %4096 = vmatprep.subr.bf16.mxu0 %v5278_v19  ;;  %v5333_v19 = vcombine.low %v2466_v9, %v2470_v12  ;;  %v5985_v9 = vld [vmem:[#allocation10 + $0xc8] sm:$0xff]  }
 0x398   :  { %4015 = vmatpush1.bf16.msra.mxu1 %v5275_v37  ;;  %v6002_v37 = vld [vmem:[#allocation10 + $0x180] sm:$0xff]  }
 0x399   :  { %4097 = vmatpush1.bf16.msra.mxu0 %v5277_v26  ;;  %4016 = vmatprep.subr.bf16.mxu1 %v5284_v28  ;;  %v6004_v26 = vld [vmem:[#allocation10 + $0x1c8] sm:$0xff]  }
 0x39a   :  { %4098 = vmatprep.subr.bf16.mxu0 %v5286_v29  ;;  %v5970_v28 = vld [vmem:[#allocation10 + $0x8] sm:$0xff]   ;;  %v5971_v29 = vld [vmem:[#allocation10 + $0x50] sm:$0xff]  }
 0x39c   :  { %4017 = vmatpush1.bf16.msra.mxu1 %v5283_v25  ;;  %v6010_v25 = vld [vmem:[#allocation10 + $0x190] sm:$0xff]  }
 0x39d   :  { %4099 = vmatpush1.bf16.msra.mxu0 %v5285_v27  ;;  %4018 = vmatprep.subr.bf16.mxu1 %v5292_v34  ;;  %v6012_v27 = vld [vmem:[#allocation10 + $0x1d8] sm:$0xff]  }
 0x39e   :  { %4100 = vmatprep.subr.bf16.mxu0 %v5294_v38  ;;  %v5974_v34 = vld [vmem:[#allocation10 + $0x18] sm:$0xff]  }
 0x39f   :  { %v6014_v38 = vld [vmem:[#allocation10 + $0x198] sm:$0xff]  }
 0x3a0   :  { %4019 = vmatpush1.bf16.msra.mxu1 %v5291_v41  ;;  %v6020_v41 = vld [vmem:[#allocation10 + $0x1e8] sm:$0xff]  }
 0x3a1   :  { %4101 = vmatpush1.bf16.msra.mxu0 %v5293_v42  ;;  %4020 = vmatprep.subr.bf16.mxu1 %v5300_v44  ;;  %v5978_v42 = vld [vmem:[#allocation10 + $0x28] sm:$0xff]   ;;  %v5979_v44 = vld [vmem:[#allocation10 + $0x70] sm:$0xff]  }
 0x3a2   :  { %4102 = vmatprep.subr.bf16.mxu0 %v5302_v0  ;;  %v6022_v0 = vld [vmem:[#allocation10 + $0x1a8] sm:$0xff]  }
 0x3a4   :  { %4021 = vmatpush1.bf16.msra.mxu1 %v5299_v6  ;;  %v6393_v6 = vld [vmem:[%s6433_s6] sm:$0xff] }
 0x3a5   :  { %4103 = vmatpush1.bf16.msra.mxu0 %v5301_v48  ;;  %4022 = vmatprep.subr.bf16.mxu1 %v5308_v49  ;;  %v2476_v48 = vrot.slane %v6393_v6, %v6336_v10  ;;  %v2480_v49 = vrot.slane %v6393_v6, %v6339_v11 }
 0x3a6   :  { %4104 = vmatprep.subr.bf16.mxu0 %v5310_v50  ;;  %v2488_v50 = vrot.slane %v6393_v6, %v1557_v15 }
 0x3a8   :  { %4023 = vmatpush1.bf16.msra.mxu1 %v5307_v57 }
 0x3a9   :  { %4105 = vmatpush1.bf16.msra.mxu0 %v5309_v58  ;;  %4024 = vmatprep.subr.bf16.mxu1 %v5316_v21  ;;  %v6024_v58 = vld [vmem:[#allocation10 + $0x1f0] sm:$0xff]  }
 0x3aa   :  { %4106 = vmatprep.subr.bf16.mxu0 %v5318_v59 }
 0x3ac   :  { %4025 = vmatpush1.bf16.msra.mxu1 %v5315_v2 }
 0x3ad   :  { %4107 = vmatpush1.bf16.msra.mxu0 %v5317_v3  ;;  %4026 = vmatprep.subr.bf16.mxu1 %v5324_v4  ;;  %v6028_v4 = vld [vmem:[#allocation10 + $0x1f8] sm:$0xff]  }
 0x3ae   :  { %4108 = vmatprep.subr.bf16.mxu0 %v5326_v5  ;;  %v5984_v5 = vld [vmem:[#allocation10 + $0x80] sm:$0xff]  }
 0x3b0   :  { %4027 = vmatpush1.bf16.msra.mxu1 %v5323_v13  ;;  %v5986_v13 = vld [vmem:[#allocation10 + $0x88] sm:$0xff]  }
 0x3b1   :  { %4109 = vmatpush1.bf16.msra.mxu0 %v5325_v14  ;;  %4028 = vmatprep.subr.bf16.mxu1 %v5332_v16  ;;  %v5987_v14 = vld [vmem:[#allocation10 + $0xd0] sm:$0xff]  }
 0x3b2   :  { %4110 = vmatprep.subr.bf16.mxu0 %v5334_v17  ;;  %v5988_v16 = vld [vmem:[#allocation10 + $0x90] sm:$0xff]   ;;  %v5989_v17 = vld [vmem:[#allocation10 + $0xd8] sm:$0xff]  }
 0x3b4   :  { %4029 = vmatpush1.bf16.msra.mxu1 %v5331_v18  ;;  %v5990_v18 = vld [vmem:[#allocation10 + $0x98] sm:$0xff]  }
 0x3b5   :  { %4111 = vmatpush1.bf16.msra.mxu0 %v5333_v19  ;;  %5468 = vmatprep.subr.bf16.mxu1 %v5967_v20  ;;  %v5991_v19 = vld [vmem:[#allocation10 + $0xe0] sm:$0xff]  }
 0x3b6   :  { %5534 = vmatprep.subr.bf16.mxu0 %v6000_v22  ;;  %v5992_v20 = vld [vmem:[#allocation10 + $0xa0] sm:$0xff]   ;;  %v5993_v22 = vld [vmem:[#allocation10 + $0xe8] sm:$0xff]  }
 0x3b7   :  { %4031 = vmatmul.mubr.bf16.vlgmr.msra.gmra.mrb[28].mxu1 %v6378_v61 }
 0x3b8   :  { %4113 = vmatmul.mubr.bf16.vlgmr.msra.gmra.mrb[12].mxu0 %v6378_v61  ;;  %5469 = vmatpush3.bf16.msra.mxu1 %v5968_v23  ;;  %v5975_v61 = vld [vmem:[#allocation10 + $0x60] sm:$0xff]   ;;  %v5994_v23 = vld [vmem:[#allocation10 + $0xa8] sm:$0xff]  }
 0x3b9   :  { %5470 = vmatprep.subr.bf16.mxu1 %v5969_v24  ;;  %5535 = vmatpush3.bf16.msra.mxu0 %v6002_v37  ;;  %v2484_v24 = vrot.slane %v6393_v6, %v6327_v52  ;;  %v5995_v37 = vld [vmem:[#allocation10 + $0xf0] sm:$0xff]   ;;  %v6005_v52 = vld [vmem:[#allocation10 + $0x108] sm:$0xff]  }
 0x3ba   :  { %5536 = vmatprep.subr.bf16.mxu0 %v6004_v26  ;;  %v5996_v26 = vld [vmem:[#allocation10 + $0xb0] sm:$0xff]  }
 0x3bc   :  { %5471 = vmatpush3.bf16.msra.mxu1 %v5970_v28 }
 0x3bd   :  { %5472 = vmatprep.subr.bf16.mxu1 %v5971_v29  ;;  %5537 = vmatpush3.bf16.msra.mxu0 %v6006_v30  ;;  %v5997_v29 = vld [vmem:[#allocation10 + $0xf8] sm:$0xff]  }
 0x3be   :  { %5538 = vmatprep.subr.bf16.mxu0 %v6008_v31  ;;  %v5998_v30 = vld [vmem:[#allocation10 + $0xb8] sm:$0xff]  }
 0x3c0   :  { %5473 = vmatpush3.bf16.msra.mxu1 %v5972_v32  ;;  %v5999_v32 = vld [vmem:[#allocation10 + $0x140] sm:$0xff]  }
 0x3c1   :  { %5474 = vmatprep.subr.bf16.mxu1 %v5973_v33  ;;  %5539 = vmatpush3.bf16.msra.mxu0 %v6010_v25  ;;  %v6001_v33 = vld [vmem:[#allocation10 + $0x100] sm:$0xff]  }
 0x3c2   :  { %5540 = vmatprep.subr.bf16.mxu0 %v6012_v27  ;;  %v6003_v27 = vld [vmem:[#allocation10 + $0x148] sm:$0xff]  }
 0x3c4   :  { %5475 = vmatpush3.bf16.msra.mxu1 %v5974_v34  ;;  %v6007_v34 = vld [vmem:[#allocation10 + $0x150] sm:$0xff]  }
 0x3c5   :  { %5476 = vmatprep.subr.bf16.mxu1 %v5975_v61  ;;  %5541 = vmatpush3.bf16.msra.mxu0 %v6014_v38  ;;  %v6009_v61 = vld [vmem:[#allocation10 + $0x110] sm:$0xff]   ;;  %v6011_v38 = vld [vmem:[#allocation10 + $0x158] sm:$0xff]  }
 0x3c6   :  { %5542 = vmatprep.subr.bf16.mxu0 %v6016_v35  ;;  %v6013_v35 = vld [vmem:[#allocation10 + $0x118] sm:$0xff]  }
 0x3c8   :  { %5477 = vmatpush3.bf16.msra.mxu1 %v5976_v36  ;;  %v6015_v36 = vld [vmem:[#allocation10 + $0x160] sm:$0xff]  }
 0x3c9   :  { %5478 = vmatprep.subr.bf16.mxu1 %v5977_v39  ;;  %5543 = vmatpush3.bf16.msra.mxu0 %v6018_v40  ;;  %v6017_v39 = vld [vmem:[#allocation10 + $0x120] sm:$0xff]   ;;  %v6019_v40 = vld [vmem:[#allocation10 + $0x168] sm:$0xff]  }
 0x3ca   :  { %5544 = vmatprep.subr.bf16.mxu0 %v6020_v41  ;;  %v6021_v41 = vld [vmem:[#allocation10 + $0x128] sm:$0xff]  }
 0x3cc   :  { %5479 = vmatpush3.bf16.msra.mxu1 %v5978_v42  ;;  %v6023_v42 = vld [vmem:[#allocation10 + $0x170] sm:$0xff]  }
 0x3cd   :  { %5480 = vmatprep.subr.bf16.mxu1 %v5979_v44  ;;  %5545 = vmatpush3.bf16.msra.mxu0 %v6022_v0  ;;  %v6025_v44 = vld [vmem:[#allocation10 + $0x130] sm:$0xff]   ;;  %v6027_v0 = vld [vmem:[#allocation10 + $0x178] sm:$0xff]  }
 0x3ce   :  { %5546 = vmatprep.subr.bf16.mxu0 %v6024_v58 }
 0x3d0   :  { %5481 = vmatpush3.bf16.msra.mxu1 %v5980_v43  ;;  %v6029_v43 = vld [vmem:[#allocation10 + $0x138] sm:$0xff]  }
 0x3d1   :  { %5482 = vmatprep.subr.bf16.mxu1 %v5981_v45  ;;  %5547 = vmatpush3.bf16.msra.mxu0 %v6026_v63  ;;  %v2491_v45 = vsub.s32 4, %v6324_v51 }
 0x3d2   :  { %5548 = vmatprep.subr.bf16.mxu0 %v6028_v4 }
 0x3d4   :  { %5483 = vmatpush3.bf16.msra.mxu1 %v5982_v46  ;;  %v2499_v46 = vsub.s32 6, %v6324_v51 }
 0x3d5   :  { %5490 = vmatprep.subr.bf16.mxu1 %v5983_v47  ;;  %5549 = vmatpush3.bf16.msra.mxu0 %v6030_v7  ;;  %v2495_v47 = vsub.s32 5, %v6324_v51 }
 0x40a   :  { %v3868_v53 = vpop.f32.mrb[24].mxu1  ;;  %v3950_v54 = vpop.f32.mrb[8].mxu0 }
 0x40b   :  { %v5570_v55 = vadd.f32 %v3868_v53, %v2476_v48  ;;  %v3870_v56 = vpop.f32.mrb[25].mxu1  ;;  %v3952_v57 = vpop.f32.mrb[9].mxu0  ;;  %v5572_v28 = vadd.f32 %v3950_v54, %v2484_v24  ;;  %v2503_v48 = vsub.s32 7, %v6324_v51  ;;  %v2496_v53 = vrot.slane %v6393_v6, %v2495_v47 }
 0x40c   :  { %v5571_v21 = vadd.f32 %v3870_v56, %v2480_v49  ;;  %v5573_v59 = vadd.f32 %v3952_v57, %v2488_v50  ;;  %v3872_v60 = vpop.f32.mrb[26].mxu1  ;;  %v3954_v62 = vpop.f32.mrb[10].mxu0  ;;  %v2492_v49 = vrot.slane %v6393_v6, %v2491_v45  ;;  %v2500_v50 = vrot.slane %v6393_v6, %v2499_v46 }
 0x40d   :  { %v4121_v1 = vmax.f32 %v5570_v55, 0.0  ;;  %v3873_v10 = vpop.f32.mrb[27].mxu1  ;;  %v3955_v2 = vpop.f32.mrb[11].mxu0  ;;  %v4123_v31 = vmax.f32 %v5572_v28, 0.0  ;;  %v2504_v54 = vrot.slane %v6393_v6, %v2503_v48 }
 0x40e   :  { %v4122_v11 = vmax.f32 %v5571_v21, 0.0  ;;  %v4124_v3 = vmax.f32 %v5573_v59, 0.0 }
 0x40f   :  { %v4129_v8 = vpack.c.bf16 %v4121_v1, %v4121_v1  ;;  %v4131_v25 = vpack.c.bf16 %v4123_v31, %v4123_v31 }
 0x410   :  { %v4130_v15 = vpack.c.bf16 %v4122_v11, %v4122_v11  ;;  %v4132_v12 = vpack.c.bf16 %v4124_v3, %v4124_v3 }
 0x412   :  { %4688 = vmatprep.mubr.bf16.mxu1 %v4130_v15 }
 0x413   :  { %4689 = vmatmul.mubr.bf16.vlgmr.msra.gmra.mrb[32].mxu1 %v4129_v8 }
 0x414   :  { %5491 = vmatpush3.bf16.msra.mxu1 %v5984_v5  ;;  %4728 = vmatprep.mubr.bf16.mxu1 %v4132_v12 }
 0x415   :  { %5492 = vmatprep.subr.bf16.mxu1 %v5985_v9 }
 0x418   :  { %5493 = vmatpush3.bf16.msra.mxu1 %v5986_v13 }
 0x419   :  { %5494 = vmatprep.subr.bf16.mxu1 %v5987_v14 }
 0x41c   :  { %5495 = vmatpush3.bf16.msra.mxu1 %v5988_v16  ;;  %v5335_v16 = vld [vmem:[%s6435_s8] ss:$0 sm:$0xff]  ;;  %s6141_s8 = scalar_lea.vmem %s4824_s10, 128 }
 0x41d   :  { %5496 = vmatprep.subr.bf16.mxu1 %v5989_v17  ;;  %p6142_p12 = scmp.ne.s32.totalorder %s4824_s10, %s6141_s8  ;;  %p6147_p0 = scmp.lt.s32.totalorder %s6141_s8, %s6141_s8 }
 0x41f   :  { %p6148_p1 = por %p6147_p0, %p6146_p13 }
 0x420   :  { %5497 = vmatpush3.bf16.msra.mxu1 %v5990_v18 }
 0x421   :  { %5498 = vmatprep.subr.bf16.mxu1 %v5991_v19  ;;  %p6149_p2 = pnand %p6148_p1, %p6142_p12 }
 0x424   :  { %5499 = vmatpush3.bf16.msra.mxu1 %v5992_v20 }
 0x425   :  { %5500 = vmatprep.subr.bf16.mxu1 %v5993_v22 }
 0x428   :  { %5501 = vmatpush3.bf16.msra.mxu1 %v5994_v23 }
 0x429   :  { %5502 = vmatprep.subr.bf16.mxu1 %v5995_v37 }
 0x42c   :  { %5503 = vmatpush3.bf16.msra.mxu1 %v5996_v26 }
 0x42d   :  { %5504 = vmatprep.subr.bf16.mxu1 %v5997_v29 }
 0x430   :  { %5505 = vmatpush3.bf16.msra.mxu1 %v5998_v30 }
 0x431   :  { %5512 = vmatprep.subr.bf16.mxu1 %v5999_v32 }
 0x433   :  { %4729 = vmatmul.mubr.bf16.vlgmr.msra.gmra.mrb[36].mxu1 %v4131_v25 }
 0x434   :  { %5513 = vmatpush3.bf16.msra.mxu1 %v6001_v33 }
 0x435   :  { %5514 = vmatprep.subr.bf16.mxu1 %v6003_v27 }
 0x438   :  { %5515 = vmatpush3.bf16.msra.mxu1 %v6005_v52 }
 0x439   :  { %5516 = vmatprep.subr.bf16.mxu1 %v6007_v34 }
 0x43c   :  { %5517 = vmatpush3.bf16.msra.mxu1 %v6009_v61 }
 0x43d   :  { %5518 = vmatprep.subr.bf16.mxu1 %v6011_v38 }
 0x440   :  { %5519 = vmatpush3.bf16.msra.mxu1 %v6013_v35 }
 0x441   :  { %5520 = vmatprep.subr.bf16.mxu1 %v6015_v36 }
 0x444   :  { %5521 = vmatpush3.bf16.msra.mxu1 %v6017_v39 }
 0x445   :  { %5522 = vmatprep.subr.bf16.mxu1 %v6019_v40 }
 0x448   :  { %5523 = vmatpush3.bf16.msra.mxu1 %v6021_v41 }
 0x449   :  { %5524 = vmatprep.subr.bf16.mxu1 %v6023_v42 }
 0x44c   :  { %5525 = vmatpush3.bf16.msra.mxu1 %v6025_v44 }
 0x44d   :  { %5526 = vmatprep.subr.bf16.mxu1 %v6027_v0 }
 0x450   :  { %5527 = vmatpush3.bf16.msra.mxu1 %v6029_v43 }
 0x48a   :  { %v4032_v55 = vpop.f32.mrb[28].mxu1 }
 0x48b   :  { %v5574_v56 = vadd.f32 %v4032_v55, %v2492_v49  ;;  %v4114_v57 = vpop.f32.mrb[12].mxu0  ;;  %v4034_v58 = vpop.f32.mrb[29].mxu1 }
 0x48c   :  { %v5576_v21 = vadd.f32 %v4114_v57, %v2500_v50  ;;  %v5575_v59 = vadd.f32 %v4034_v58, %v2496_v53  ;;  %v4116_v60 = vpop.f32.mrb[13].mxu0  ;;  %v4036_v62 = vpop.f32.mrb[30].mxu1 }
 0x48d   :  { %v4125_v63 = vmax.f32 %v5574_v56, 0.0  ;;  %v5577_v1 = vadd.f32 %v4116_v60, %v2504_v54  ;;  %v4118_v10 = vpop.f32.mrb[14].mxu0  ;;  %v4037_v51 = vpop.f32.mrb[31].mxu1 }
 0x48e   :  { %v4127_v2 = vmax.f32 %v5576_v21, 0.0  ;;  %v4126_v11 = vmax.f32 %v5575_v59, 0.0  ;;  %v4119_v3 = vpop.f32.mrb[15].mxu0 }
 0x48f   :  { %v4128_v4 = vmax.f32 %v5577_v1, 0.0  ;;  %v4133_v5 = vpack.c.bf16 %v4125_v63, %v4125_v63 }
 0x490   :  { %v4134_v15 = vpack.c.bf16 %v4126_v11, %v4126_v11  ;;  %v4135_v6 = vpack.c.bf16 %v4127_v2, %v4127_v2 }
 0x491   :  { %v4136_v7 = vpack.c.bf16 %v4128_v4, %v4128_v4 }
 0x492   :  { %4768 = vmatprep.mubr.bf16.mxu1 %v4134_v15 }
 0x493   :  { %4808 = vmatprep.mubr.bf16.mxu0 %v4136_v7  ;;  %4769 = vmatmul.mubr.bf16.vlgmr.msra.gmra.mrb[40].mxu1 %v4133_v5 }
 0x494   :  { %4809 = vmatmul.mubr.bf16.vlgmr.msra.gmra.mrb[16].mxu0 %v4135_v6 }
 0x4e6   :  { %v5484_v8 = vpop.f32.mrb[32].mxu1 }
 0x4e7   :  { %v5485_v9 = vpop.f32.mrb[33].mxu1 }
 0x4e8   :  { %v5486_v12 = vadd.f32 %v5485_v9, %v5484_v8  ;;  %v5487_v13 = vpop.f32.mrb[34].mxu1 }
 0x4e9   :  { %v5488_v14 = vpop.f32.mrb[35].mxu1 }
 0x4ea   :  { %v4691_v19 = vadd.f32 %v5486_v12, %v5335_v16 }
 0x506   :  { %v5506_v17 = vpop.f32.mrb[36].mxu1 }
 0x507   :  { %v5507_v18 = vpop.f32.mrb[37].mxu1 }
 0x508   :  { %v5508_v20 = vadd.f32 %v5507_v18, %v5506_v17  ;;  %v5509_v22 = vpop.f32.mrb[38].mxu1 }
 0x509   :  { %v5510_v23 = vpop.f32.mrb[39].mxu1 }
 0x50a   :  { %v4731_v24 = vadd.f32 %v5508_v20, %v4691_v19 }
 0x566   :  { %v5528_v37 = vpop.f32.mrb[40].mxu1 }
 0x567   :  { %v5550_v26 = vpop.f32.mrb[16].mxu0  ;;  %v5529_v28 = vpop.f32.mrb[41].mxu1 }
 0x568   :  { %v5530_v29 = vadd.f32 %v5529_v28, %v5528_v37  ;;  %v5551_v30 = vpop.f32.mrb[17].mxu0  ;;  %v5531_v31 = vpop.f32.mrb[42].mxu1 }
 0x569   :  { %v5552_v32 = vadd.f32 %v5551_v30, %v5550_v26  ;;  %v5553_v33 = vpop.f32.mrb[18].mxu0  ;;  %v5532_v25 = vpop.f32.mrb[43].mxu1 }
 0x56a   :  { %v4771_v27 = vadd.f32 %v5530_v29, %v4731_v24  ;;  %v5554_v52 = vpop.f32.mrb[19].mxu0 }
 0x56c   :  { %v4811_v34 = vadd.f32 %v5552_v32, %v4771_v27 }
 0x56e   :  { %4816 = vst [vmem:[#allocation11] sm:$0xff] %v4811_v34 }
 0x56f   :  { %6152 = shalt.err (!%p6149_p2)
}
 0x570   :  { %s6153_s14 = scalar_lea.hbm %s6436_s9, 128 }
 0x571   :  { %p6154_p3 = scmp.ne.s32.totalorder %s6436_s9, %s6153_s14  ;;  %p6157_p4 = scmp.lt.u32.totalorder %s6153_s14, %s6436_s9 }
 0x573   :  { %p6159_p5 = pnand %p6157_p4, %p6154_p3 }
 0x575   :  { %6162 = shalt.err (!%p6159_p5)
}
 0x576   :  { %4826 = dma.vmem_to_hbm [thread:$0]  %s4824_s10, 128, %s6436_s9, [#allocation4]  }
 0x577   :  { %6169 = dma.done.wait [#allocation4], 128  }
 0x578   :  { %6170 = vsyncadd [#allocation4], 4294967168 }
 0x579   :  { %4830 = vsyncpa [#allocation3], 1 }
 0x57a   :  { %4831 = vsyncpa [#allocation6], 1 }
 0x57b   :  { %4832 = vsyncpa [#allocation9], 1 }
 0x57c   :  { %4833 = vsyncpa [#allocation4], 1 }

</bundles_post_ra>
